<compile_context>
chip_gen: v7x
topology: tpu7x:2x2x1
jax: 0.10.0
libtpu: 0.0.40
codegen_flags: <defaults>
</compile_context>

<pallas_src>
import numpy as np
import jax
import jax.numpy as jnp
from jax import lax
from jax.experimental import pallas as pl
from jax.experimental.pallas import tpu as pltpu

# ---------------- config (small, consistent with the module) ----------------
VOCAB = 64
VPAD = 128                     # lane-dense padded vocab for the logits store
D_MODEL = 32
N_HEADS = 4
HEAD_DIM = D_MODEL // N_HEADS
FFN_DIM = 64
N_LAYERS = 2
SEQ = 8
BATCH = 2
BS = BATCH * SEQ
LN_EPS = 1e-5                  # torch.nn.LayerNorm default

SLAB_ROWS = BS + 4 * N_LAYERS  # 16 cos/sin/mask rows + 4 param rows per layer


# ---------------------------- Pallas kernel ----------------------------------
def _layernorm(x, g, b):
    mu = jnp.mean(x, axis=-1, keepdims=True)
    var = jnp.mean((x - mu) ** 2, axis=-1, keepdims=True)
    return (x - mu) * lax.rsqrt(var + LN_EPS) * g + b


def fused_forward_kernel(
    ids_ref,        # (BS, 1)   int32
    slab_ref,       # (SLAB_ROWS, 128) f32 packed constants (see pack_params)
    emb_ref,        # (VPAD, D) padded embedding table (tied lm_head weight)
    wqkv_ref,       # (L, D, 5D)  [wq*s, (wq*s)@rot, wk, wk@rot, wv]
    wo_ref,         # (L, D, D)
    w1_ref,         # (L, D, F)
    w2_ref,         # (L, F, D)
    logits_ref,     # (BS, VPAD) output
):
    D, HD, H, F = D_MODEL, HEAD_DIM, N_HEADS, FFN_DIM

    slab = slab_ref[...]                                   # (SLAB_ROWS, 128)
    cos = slab[0:BS, 0:D]                                  # (BS, D)
    sin = slab[0:BS, D:2 * D]                              # (BS, D)
    mask = slab[0:BS, 2 * D:2 * D + BS]                    # (BS, BS) batch+causal

    # --- embedding gather as a one-hot matmul (no in-kernel gather) ---
    ids = ids_ref[...]                                     # (BS, 1)
    iota_v = lax.broadcasted_iota(jnp.int32, (BS, VPAD), 1)
    one_hot = (ids == iota_v).astype(jnp.float32)          # (BS, VPAD)
    emb = emb_ref[...]                                     # (VPAD, D)
    x = jnp.dot(one_hot, emb, preferred_element_type=jnp.float32)   # (BS, D)

    for li in range(N_LAYERS):        # static unroll; weights stay in VMEM
        base = BS + 4 * li
        rowA = slab[base:base + 1, :]
        rowB = slab[base + 1:base + 2, :]
        rowC = slab[base + 2:base + 3, :]
        rowD = slab[base + 3:base + 4, :]
        bq_s, bq_rot = rowA[:, 0:D], rowA[:, D:2 * D]
        bk_, bk_rot = rowA[:, 2 * D:3 * D], rowA[:, 3 * D:4 * D]
        bv_, bo_, b2_ = rowB[:, 0:D], rowB[:, D:2 * D], rowB[:, 2 * D:3 * D]
        b1_ = rowC[:, 0:F]
        g1_, be1_ = rowD[:, 0:D], rowD[:, D:2 * D]
        g2_, be2_ = rowD[:, 2 * D:3 * D], rowD[:, 3 * D:4 * D]

        # --- fused QKV projection (one MXU push); RoPE is elementwise only ---
        qkv = jnp.dot(x, wqkv_ref[li], preferred_element_type=jnp.float32)  # (BS, 5D)
        q = (qkv[:, 0:D] + bq_s) * cos + (qkv[:, D:2 * D] + bq_rot) * sin
        k = (qkv[:, 2 * D:3 * D] + bk_) * cos + (qkv[:, 3 * D:4 * D] + bk_rot) * sin
        v = qkv[:, 4 * D:5 * D] + bv_

        # --- causal MHA: per head, plain 2-D matmuls over all BS tokens with
        #     the combined batch-block-diagonal + causal mask.  Score scale is
        #     pre-folded into the q weights.  Head outputs stay as values. ---
        outs = []
        for h in range(H):
            sl = slice(h * HD, (h + 1) * HD)
            qh, kh, vh = q[:, sl], k[:, sl], v[:, sl]
            s = jnp.dot(qh, kh.T, preferred_element_type=jnp.float32) + mask  # (BS, BS)
            s = s - jnp.max(s, axis=-1, keepdims=True)
            p = jnp.exp(s)
            p = p * pl.reciprocal(jnp.sum(p, axis=-1, keepdims=True), approx=False)
            outs.append(jnp.dot(p, vh, preferred_element_type=jnp.float32))   # (BS, HD)
        attn = jnp.concatenate(outs, axis=1)                                  # (BS, D)
        attn = jnp.dot(attn, wo_ref[li], preferred_element_type=jnp.float32) + bo_

        # --- residual + LN1 (dropout = identity in eval) ---
        h1 = _layernorm(x + attn, g1_, be1_)

        # --- FFN: Linear -> ReLU -> Linear ---
        f = jnp.dot(h1, w1_ref[li], preferred_element_type=jnp.float32) + b1_
        f = jnp.maximum(f, 0.0)
        f = jnp.dot(f, w2_ref[li], preferred_element_type=jnp.float32) + b2_

        # --- residual + LN2 ---
        x = _layernorm(h1 + f, g2_, be2_)

    # --- tied lm_head: logits = hidden @ E_pad.T (lane-dense 128-wide store) ---
    logits_ref[...] = lax.dot_general(x, emb, (((1,), (1,)), ((), ())),
                                      preferred_element_type=jnp.float32)


# ------------------------------ wrapper ---------------------------------------
def roformer_forward(input_ids, packed):
    ids = input_ids.reshape(BS, 1).astype(jnp.int32)
    vmem = pl.BlockSpec(memory_space=pltpu.MemorySpace.VMEM)
    logits_pad = pl.pallas_call(
        fused_forward_kernel,
        out_shape=jax.ShapeDtypeStruct((BS, VPAD), jnp.float32),
        in_specs=[vmem] * 7,
        out_specs=vmem,
    )(
        ids, packed["slab"], packed["emb_pad"], packed["wqkv"],
        packed["wo"], packed["w1"], packed["w2"],
    )
    logits = logits_pad[:, :VOCAB].reshape(BATCH, SEQ, VOCAB)
    return {"loss": None, "logits": logits}


# --------------------------- param / aux setup --------------------------------
def make_rope_tables(seq, n_heads, head_dim, d_model):
    half = head_dim // 2
    inv_freq = 1.0 / (10000.0 ** (np.arange(half, dtype=np.float32) / half))
    ang = np.arange(seq, dtype=np.float32)[:, None] * inv_freq[None, :]  # (S, hd/2)
    cos_h = np.concatenate([np.cos(ang), np.cos(ang)], axis=-1)          # (S, hd)
    sin_h = np.concatenate([np.sin(ang), np.sin(ang)], axis=-1)          # (S, hd)
    cos = np.tile(cos_h, (1, n_heads))                                   # (S, D)
    sin = np.tile(sin_h, (1, n_heads))                                   # (S, D)
    # rotate_half as a matmul: (q @ rot)[:, i] = -q[:, i+half] (1st half)
    #                                             +q[:, i-half] (2nd half)
    rot = np.zeros((d_model, d_model), dtype=np.float32)
    for h in range(n_heads):
        o = h * head_dim
        for i in range(half):
            rot[o + half + i, o + i] = -1.0
            rot[o + i, o + half + i] = 1.0
    return jnp.asarray(cos), jnp.asarray(sin), jnp.asarray(rot)


def init_params(key):
    def nrm(k, shape, scale=0.02):
        return (scale * jax.random.normal(k, shape)).astype(jnp.float32)

    keys = jax.random.split(key, 1 + N_LAYERS)
    emb = nrm(keys[0], (VOCAB, D_MODEL))
    layers = []
    for li in range(N_LAYERS):
        ks = jax.random.split(keys[1 + li], 16)
        layers.append(dict(
            wq=nrm(ks[0], (D_MODEL, D_MODEL)), bq=nrm(ks[1], (1, D_MODEL)),
            wk=nrm(ks[2], (D_MODEL, D_MODEL)), bk=nrm(ks[3], (1, D_MODEL)),
            wv=nrm(ks[4], (D_MODEL, D_MODEL)), bv=nrm(ks[5], (1, D_MODEL)),
            wo=nrm(ks[6], (D_MODEL, D_MODEL)), bo=nrm(ks[7], (1, D_MODEL)),
            g1=jnp.ones((1, D_MODEL), jnp.float32), be1=jnp.zeros((1, D_MODEL), jnp.float32),
            w1=nrm(ks[8], (D_MODEL, FFN_DIM)), b1=nrm(ks[9], (1, FFN_DIM)),
            w2=nrm(ks[10], (FFN_DIM, D_MODEL)), b2=nrm(ks[11], (1, D_MODEL)),
            g2=jnp.ones((1, D_MODEL), jnp.float32), be2=jnp.zeros((1, D_MODEL), jnp.float32),
        ))
    cos, sin, rot = make_rope_tables(SEQ, N_HEADS, HEAD_DIM, D_MODEL)
    mask = jnp.where(np.tril(np.ones((SEQ, SEQ), dtype=bool)), 0.0, -1e9
                     ).astype(jnp.float32)
    return dict(emb=emb, layers=layers, cos=cos, sin=sin, rot=rot, mask=mask)


def pack_params(params):
    """Build kernel-layout operands: RoPE folded into QKV weights/biases,
    all small constants packed into one lane-dense (SLAB_ROWS, 128) slab."""
    D, F = D_MODEL, FFN_DIM
    scale = 1.0 / np.sqrt(HEAD_DIM)
    rot = np.asarray(params["rot"])                                   # (D, D)

    emb_pad = jnp.zeros((VPAD, D), jnp.float32).at[:VOCAB].set(params["emb"])

    # rows 0..BS-1:  [cos(D) | sin(D) | combined batch+causal mask(BS) | pad]
    cs_rows = np.zeros((BS, 128), np.float32)
    cs = np.tile(np.concatenate([np.asarray(params["cos"]),
                                 np.asarray(params["sin"])], axis=1), (BATCH, 1))
    cs_rows[:, :2 * D] = cs
    r = np.arange(BS)[:, None]
    c = np.arange(BS)[None, :]
    allowed = ((r // SEQ) == (c // SEQ)) & (c <= r)
    cs_rows[:, 2 * D:2 * D + BS] = np.where(allowed, 0.0, -1e9).astype(np.float32)

    wqkv, wo, w1, w2, layer_rows = [], [], [], [], []
    for p in params["layers"]:
        wq_s = np.asarray(p["wq"]) * scale
        wk = np.asarray(p["wk"])
        wqkv.append(np.concatenate(
            [wq_s, wq_s @ rot, wk, wk @ rot, np.asarray(p["wv"])], axis=1))   # (D, 5D)
        wo.append(np.asarray(p["wo"]))
        w1.append(np.asarray(p["w1"]))
        w2.append(np.asarray(p["w2"]))

        bq_s = np.asarray(p["bq"]) * scale
        bk_ = np.asarray(p["bk"])
        rowA = np.concatenate([bq_s, bq_s @ rot, bk_, bk_ @ rot], axis=1)     # (1,128)
        rowB = np.concatenate([np.asarray(p["bv"]), np.asarray(p["bo"]),
                               np.asarray(p["b2"]),
                               np.zeros((1, D), np.float32)], axis=1)
        rowC = np.concatenate([np.asarray(p["b1"]),
                               np.zeros((1, 128 - F), np.float32)], axis=1)
        rowD = np.concatenate([np.asarray(p["g1"]), np.asarray(p["be1"]),
                               np.asarray(p["g2"]), np.asarray(p["be2"])], axis=1)
        layer_rows.append(np.concatenate([rowA, rowB, rowC, rowD], axis=0))   # (4,128)

    slab = np.concatenate([cs_rows] + layer_rows, axis=0)     # (SLAB_ROWS, 128)
    assert slab.shape == (SLAB_ROWS, 128)

    return dict(
        emb_pad=emb_pad,
        wqkv=jnp.asarray(np.stack(wqkv)),
        wo=jnp.asarray(np.stack(wo)),
        w1=jnp.asarray(np.stack(w1)),
        w2=jnp.asarray(np.stack(w2)),
        slab=jnp.asarray(slab),
    )


# --------------------------- pure-JAX reference --------------------------------
def ref_forward(input_ids, params):
    def ln(x, g, b):
        mu = x.mean(-1, keepdims=True)
        var = ((x - mu) ** 2).mean(-1, keepdims=True)
        return (x - mu) / jnp.sqrt(var + LN_EPS) * g + b

    x = params["emb"][input_ids]
    cos, sin, rot, mask = params["cos"], params["sin"], params["rot"], params["mask"]
    for p in params["layers"]:
        q = x @ p["wq"] + p["bq"]
        k = x @ p["wk"] + p["bk"]
        v = x @ p["wv"] + p["bv"]
        q = q * cos + (q @ rot) * sin
        k = k * cos + (k @ rot) * sin
        qh = q.reshape(BATCH, SEQ, N_HEADS, HEAD_DIM).transpose(0, 2, 1, 3)
        kh = k.reshape(BATCH, SEQ, N_HEADS, HEAD_DIM).transpose(0, 2, 1, 3)
        vh = v.reshape(BATCH, SEQ, N_HEADS, HEAD_DIM).transpose(0, 2, 1, 3)
        s = jnp.einsum("bhqd,bhkd->bhqk", qh, kh) / np.sqrt(HEAD_DIM) + mask
        a = jax.nn.softmax(s, axis=-1)
        o = jnp.einsum("bhqk,bhkd->bhqd", a, vh).transpose(0, 2, 1, 3).reshape(
            BATCH, SEQ, D_MODEL)
        o = o @ p["wo"] + p["bo"]
        x = ln(x + o, p["g1"], p["be1"])
        f = jnp.maximum(x @ p["w1"] + p["b1"], 0.0) @ p["w2"] + p["b2"]
        x = ln(x + f, p["g2"], p["be2"])
    return x @ params["emb"].T


# --------------------------------- main ----------------------------------------
if __name__ == "__main__":
    key = jax.random.PRNGKey(0)
    pkey, ikey = jax.random.split(key)
    params = init_params(pkey)
    packed = pack_params(params)
    input_ids = jax.random.randint(ikey, (BATCH, SEQ), 0, VOCAB, dtype=jnp.int32)

    out = roformer_forward(input_ids, packed)
    logits = jax.block_until_ready(out["logits"])

    expected = ref_forward(input_ids, params)
    np.testing.assert_allclose(np.asarray(logits), np.asarray(expected),
                               rtol=1e-4, atol=1e-4)
    assert logits.shape == (BATCH, SEQ, VOCAB)
    print("KERNEL_OK")
</pallas_src>

<mosaic_0001>
module attributes {stable_mosaic.version = 11 : i64} {
  func.func @fused_forward_kernel(%arg0: memref<16x1xi32, #tpu.memory_space<vmem>>, %arg1: memref<24x128xf32, #tpu.memory_space<vmem>>, %arg2: memref<128x32xf32, #tpu.memory_space<vmem>>, %arg3: memref<2x32x160xf32, #tpu.memory_space<vmem>>, %arg4: memref<2x32x32xf32, #tpu.memory_space<vmem>>, %arg5: memref<2x32x64xf32, #tpu.memory_space<vmem>>, %arg6: memref<2x64x32xf32, #tpu.memory_space<vmem>>, %arg7: memref<16x128xf32, #tpu.memory_space<vmem>>) attributes {dimension_semantics = [], scalar_prefetch = 0 : i64, scratch_operands = 0 : i64, tpu.core_type = #tpu.core_type<tc>} {
    %c0 = arith.constant 0 : index
    %c0_0 = arith.constant 0 : index
    %0 = vector.load %arg1[%c0, %c0_0] : memref<24x128xf32, #tpu.memory_space<vmem>>, vector<24x128xf32>
    %1 = vector.extract_strided_slice %0 {offsets = [0, 0], sizes = [16, 32], strides = [1, 1]} : vector<24x128xf32> to vector<16x32xf32>
    %2 = vector.extract_strided_slice %0 {offsets = [0, 32], sizes = [16, 32], strides = [1, 1]} : vector<24x128xf32> to vector<16x32xf32>
    %3 = vector.extract_strided_slice %0 {offsets = [0, 64], sizes = [16, 16], strides = [1, 1]} : vector<24x128xf32> to vector<16x16xf32>
    %c0_1 = arith.constant 0 : index
    %c0_2 = arith.constant 0 : index
    %4 = vector.load %arg0[%c0_1, %c0_2] : memref<16x1xi32, #tpu.memory_space<vmem>>, vector<16x1xi32>
    %5 = tpu.iota {dimensions = array<i32: 1>} : vector<16x128xi32>
    %6 = vector.broadcast %4 : vector<16x1xi32> to vector<16x128xi32>
    %7 = arith.cmpi eq, %6, %5 : vector<16x128xi32>
    %8 = arith.extui %7 : vector<16x128xi1> to vector<16x128xi32>
    %9 = arith.sitofp %8 : vector<16x128xi32> to vector<16x128xf32>
    %c0_3 = arith.constant 0 : index
    %c0_4 = arith.constant 0 : index
    %10 = vector.load %arg2[%c0_3, %c0_4] : memref<128x32xf32, #tpu.memory_space<vmem>>, vector<128x32xf32>
    %cst = arith.constant dense<0.000000e+00> : vector<16x32xf32>
    %11 = tpu.matmul %9, %10, %cst {dimension_numbers = #tpu.dot_dimension_numbers<[1], [0], [0], [1], [0, 0, 1, 1], [], []>} : vector<16x128xf32>, vector<128x32xf32>, vector<16x32xf32> -> vector<16x32xf32>
    %12 = vector.extract_strided_slice %0 {offsets = [16, 0], sizes = [1, 128], strides = [1, 1]} : vector<24x128xf32> to vector<1x128xf32>
    %13 = vector.extract_strided_slice %0 {offsets = [17, 0], sizes = [1, 128], strides = [1, 1]} : vector<24x128xf32> to vector<1x128xf32>
    %14 = vector.extract_strided_slice %0 {offsets = [18, 0], sizes = [1, 128], strides = [1, 1]} : vector<24x128xf32> to vector<1x128xf32>
    %15 = vector.extract_strided_slice %0 {offsets = [19, 0], sizes = [1, 128], strides = [1, 1]} : vector<24x128xf32> to vector<1x128xf32>
    %16 = vector.extract_strided_slice %12 {offsets = [0, 0], sizes = [1, 32], strides = [1, 1]} : vector<1x128xf32> to vector<1x32xf32>
    %17 = vector.extract_strided_slice %12 {offsets = [0, 32], sizes = [1, 32], strides = [1, 1]} : vector<1x128xf32> to vector<1x32xf32>
    %18 = vector.extract_strided_slice %12 {offsets = [0, 64], sizes = [1, 32], strides = [1, 1]} : vector<1x128xf32> to vector<1x32xf32>
    %19 = vector.extract_strided_slice %12 {offsets = [0, 96], sizes = [1, 32], strides = [1, 1]} : vector<1x128xf32> to vector<1x32xf32>
    %20 = vector.extract_strided_slice %13 {offsets = [0, 0], sizes = [1, 32], strides = [1, 1]} : vector<1x128xf32> to vector<1x32xf32>
    %21 = vector.extract_strided_slice %13 {offsets = [0, 32], sizes = [1, 32], strides = [1, 1]} : vector<1x128xf32> to vector<1x32xf32>
    %22 = vector.extract_strided_slice %13 {offsets = [0, 64], sizes = [1, 32], strides = [1, 1]} : vector<1x128xf32> to vector<1x32xf32>
    %23 = vector.extract_strided_slice %14 {offsets = [0, 0], sizes = [1, 64], strides = [1, 1]} : vector<1x128xf32> to vector<1x64xf32>
    %24 = vector.extract_strided_slice %15 {offsets = [0, 0], sizes = [1, 32], strides = [1, 1]} : vector<1x128xf32> to vector<1x32xf32>
    %25 = vector.extract_strided_slice %15 {offsets = [0, 32], sizes = [1, 32], strides = [1, 1]} : vector<1x128xf32> to vector<1x32xf32>
    %26 = vector.extract_strided_slice %15 {offsets = [0, 64], sizes = [1, 32], strides = [1, 1]} : vector<1x128xf32> to vector<1x32xf32>
    %27 = vector.extract_strided_slice %15 {offsets = [0, 96], sizes = [1, 32], strides = [1, 1]} : vector<1x128xf32> to vector<1x32xf32>
    %c0_5 = arith.constant 0 : index
    %c0_6 = arith.constant 0 : index
    %c0_7 = arith.constant 0 : index
    %28 = vector.load %arg3[%c0_5, %c0_6, %c0_7] : memref<2x32x160xf32, #tpu.memory_space<vmem>>, vector<1x32x160xf32>
    %29 = vector.shape_cast %28 : vector<1x32x160xf32> to vector<32x160xf32>
    %cst_8 = arith.constant dense<0.000000e+00> : vector<16x160xf32>
    %30 = tpu.matmul %11, %29, %cst_8 {dimension_numbers = #tpu.dot_dimension_numbers<[1], [0], [0], [1], [0, 0, 1, 1], [], []>} : vector<16x32xf32>, vector<32x160xf32>, vector<16x160xf32> -> vector<16x160xf32>
    %31 = vector.extract_strided_slice %30 {offsets = [0, 0], sizes = [16, 32], strides = [1, 1]} : vector<16x160xf32> to vector<16x32xf32>
    %32 = vector.broadcast %16 : vector<1x32xf32> to vector<16x32xf32>
    %33 = arith.addf %31, %32 : vector<16x32xf32>
    %34 = arith.mulf %33, %1 : vector<16x32xf32>
    %35 = vector.extract_strided_slice %30 {offsets = [0, 32], sizes = [16, 32], strides = [1, 1]} : vector<16x160xf32> to vector<16x32xf32>
    %36 = vector.broadcast %17 : vector<1x32xf32> to vector<16x32xf32>
    %37 = arith.addf %35, %36 : vector<16x32xf32>
    %38 = arith.mulf %37, %2 : vector<16x32xf32>
    %39 = arith.addf %34, %38 : vector<16x32xf32>
    %40 = vector.extract_strided_slice %30 {offsets = [0, 64], sizes = [16, 32], strides = [1, 1]} : vector<16x160xf32> to vector<16x32xf32>
    %41 = vector.broadcast %18 : vector<1x32xf32> to vector<16x32xf32>
    %42 = arith.addf %40, %41 : vector<16x32xf32>
    %43 = arith.mulf %42, %1 : vector<16x32xf32>
    %44 = vector.extract_strided_slice %30 {offsets = [0, 96], sizes = [16, 32], strides = [1, 1]} : vector<16x160xf32> to vector<16x32xf32>
    %45 = vector.broadcast %19 : vector<1x32xf32> to vector<16x32xf32>
    %46 = arith.addf %44, %45 : vector<16x32xf32>
    %47 = arith.mulf %46, %2 : vector<16x32xf32>
    %48 = arith.addf %43, %47 : vector<16x32xf32>
    %49 = vector.extract_strided_slice %30 {offsets = [0, 128], sizes = [16, 32], strides = [1, 1]} : vector<16x160xf32> to vector<16x32xf32>
    %50 = vector.broadcast %20 : vector<1x32xf32> to vector<16x32xf32>
    %51 = arith.addf %49, %50 : vector<16x32xf32>
    %52 = vector.extract_strided_slice %39 {offsets = [0, 0], sizes = [16, 8], strides = [1, 1]} : vector<16x32xf32> to vector<16x8xf32>
    %53 = vector.extract_strided_slice %48 {offsets = [0, 0], sizes = [16, 8], strides = [1, 1]} : vector<16x32xf32> to vector<16x8xf32>
    %54 = vector.extract_strided_slice %51 {offsets = [0, 0], sizes = [16, 8], strides = [1, 1]} : vector<16x32xf32> to vector<16x8xf32>
    %55 = tpu.transpose %53, [1, 0] : vector<16x8xf32> -> vector<8x16xf32>
    %cst_9 = arith.constant dense<0.000000e+00> : vector<16x16xf32>
    %56 = tpu.matmul %52, %55, %cst_9 {dimension_numbers = #tpu.dot_dimension_numbers<[1], [0], [0], [1], [0, 0, 1, 1], [], []>} : vector<16x8xf32>, vector<8x16xf32>, vector<16x16xf32> -> vector<16x16xf32>
    %57 = arith.addf %56, %3 : vector<16x16xf32>
    %cst_10 = arith.constant dense<0xFF800000> : vector<16xf32>
    %58 = vector.multi_reduction <maximumf>, %57, %cst_10 [1] : vector<16x16xf32> to vector<16xf32>
    %59 = vector.shape_cast %58 : vector<16xf32> to vector<16x1xf32>
    %60 = vector.broadcast %59 : vector<16x1xf32> to vector<16x16xf32>
    %61 = arith.subf %57, %60 : vector<16x16xf32>
    %62 = math.exp %61 : vector<16x16xf32>
    %cst_11 = arith.constant dense<0.000000e+00> : vector<16xf32>
    %63 = vector.multi_reduction <add>, %62, %cst_11 [1] : vector<16x16xf32> to vector<16xf32>
    %64 = vector.shape_cast %63 : vector<16xf32> to vector<16x1xf32>
    %65 = tpu.reciprocal %64 : vector<16x1xf32> -> vector<16x1xf32>
    %66 = vector.broadcast %65 : vector<16x1xf32> to vector<16x16xf32>
    %67 = arith.mulf %62, %66 : vector<16x16xf32>
    %cst_12 = arith.constant dense<0.000000e+00> : vector<16x8xf32>
    %68 = tpu.matmul %67, %54, %cst_12 {dimension_numbers = #tpu.dot_dimension_numbers<[1], [0], [0], [1], [0, 0, 1, 1], [], []>} : vector<16x16xf32>, vector<16x8xf32>, vector<16x8xf32> -> vector<16x8xf32>
    %69 = vector.extract_strided_slice %39 {offsets = [0, 8], sizes = [16, 8], strides = [1, 1]} : vector<16x32xf32> to vector<16x8xf32>
    %70 = vector.extract_strided_slice %48 {offsets = [0, 8], sizes = [16, 8], strides = [1, 1]} : vector<16x32xf32> to vector<16x8xf32>
    %71 = vector.extract_strided_slice %51 {offsets = [0, 8], sizes = [16, 8], strides = [1, 1]} : vector<16x32xf32> to vector<16x8xf32>
    %72 = tpu.transpose %70, [1, 0] : vector<16x8xf32> -> vector<8x16xf32>
    %cst_13 = arith.constant dense<0.000000e+00> : vector<16x16xf32>
    %73 = tpu.matmul %69, %72, %cst_13 {dimension_numbers = #tpu.dot_dimension_numbers<[1], [0], [0], [1], [0, 0, 1, 1], [], []>} : vector<16x8xf32>, vector<8x16xf32>, vector<16x16xf32> -> vector<16x16xf32>
    %74 = arith.addf %73, %3 : vector<16x16xf32>
    %cst_14 = arith.constant dense<0xFF800000> : vector<16xf32>
    %75 = vector.multi_reduction <maximumf>, %74, %cst_14 [1] : vector<16x16xf32> to vector<16xf32>
    %76 = vector.shape_cast %75 : vector<16xf32> to vector<16x1xf32>
    %77 = vector.broadcast %76 : vector<16x1xf32> to vector<16x16xf32>
    %78 = arith.subf %74, %77 : vector<16x16xf32>
    %79 = math.exp %78 : vector<16x16xf32>
    %cst_15 = arith.constant dense<0.000000e+00> : vector<16xf32>
    %80 = vector.multi_reduction <add>, %79, %cst_15 [1] : vector<16x16xf32> to vector<16xf32>
    %81 = vector.shape_cast %80 : vector<16xf32> to vector<16x1xf32>
    %82 = tpu.reciprocal %81 : vector<16x1xf32> -> vector<16x1xf32>
    %83 = vector.broadcast %82 : vector<16x1xf32> to vector<16x16xf32>
    %84 = arith.mulf %79, %83 : vector<16x16xf32>
    %cst_16 = arith.constant dense<0.000000e+00> : vector<16x8xf32>
    %85 = tpu.matmul %84, %71, %cst_16 {dimension_numbers = #tpu.dot_dimension_numbers<[1], [0], [0], [1], [0, 0, 1, 1], [], []>} : vector<16x16xf32>, vector<16x8xf32>, vector<16x8xf32> -> vector<16x8xf32>
    %86 = vector.extract_strided_slice %39 {offsets = [0, 16], sizes = [16, 8], strides = [1, 1]} : vector<16x32xf32> to vector<16x8xf32>
    %87 = vector.extract_strided_slice %48 {offsets = [0, 16], sizes = [16, 8], strides = [1, 1]} : vector<16x32xf32> to vector<16x8xf32>
    %88 = vector.extract_strided_slice %51 {offsets = [0, 16], sizes = [16, 8], strides = [1, 1]} : vector<16x32xf32> to vector<16x8xf32>
    %89 = tpu.transpose %87, [1, 0] : vector<16x8xf32> -> vector<8x16xf32>
    %cst_17 = arith.constant dense<0.000000e+00> : vector<16x16xf32>
    %90 = tpu.matmul %86, %89, %cst_17 {dimension_numbers = #tpu.dot_dimension_numbers<[1], [0], [0], [1], [0, 0, 1, 1], [], []>} : vector<16x8xf32>, vector<8x16xf32>, vector<16x16xf32> -> vector<16x16xf32>
    %91 = arith.addf %90, %3 : vector<16x16xf32>
    %cst_18 = arith.constant dense<0xFF800000> : vector<16xf32>
    %92 = vector.multi_reduction <maximumf>, %91, %cst_18 [1] : vector<16x16xf32> to vector<16xf32>
    %93 = vector.shape_cast %92 : vector<16xf32> to vector<16x1xf32>
    %94 = vector.broadcast %93 : vector<16x1xf32> to vector<16x16xf32>
    %95 = arith.subf %91, %94 : vector<16x16xf32>
    %96 = math.exp %95 : vector<16x16xf32>
    %cst_19 = arith.constant dense<0.000000e+00> : vector<16xf32>
    %97 = vector.multi_reduction <add>, %96, %cst_19 [1] : vector<16x16xf32> to vector<16xf32>
    %98 = vector.shape_cast %97 : vector<16xf32> to vector<16x1xf32>
    %99 = tpu.reciprocal %98 : vector<16x1xf32> -> vector<16x1xf32>
    %100 = vector.broadcast %99 : vector<16x1xf32> to vector<16x16xf32>
    %101 = arith.mulf %96, %100 : vector<16x16xf32>
    %cst_20 = arith.constant dense<0.000000e+00> : vector<16x8xf32>
    %102 = tpu.matmul %101, %88, %cst_20 {dimension_numbers = #tpu.dot_dimension_numbers<[1], [0], [0], [1], [0, 0, 1, 1], [], []>} : vector<16x16xf32>, vector<16x8xf32>, vector<16x8xf32> -> vector<16x8xf32>
    %103 = vector.extract_strided_slice %39 {offsets = [0, 24], sizes = [16, 8], strides = [1, 1]} : vector<16x32xf32> to vector<16x8xf32>
    %104 = vector.extract_strided_slice %48 {offsets = [0, 24], sizes = [16, 8], strides = [1, 1]} : vector<16x32xf32> to vector<16x8xf32>
    %105 = vector.extract_strided_slice %51 {offsets = [0, 24], sizes = [16, 8], strides = [1, 1]} : vector<16x32xf32> to vector<16x8xf32>
    %106 = tpu.transpose %104, [1, 0] : vector<16x8xf32> -> vector<8x16xf32>
    %cst_21 = arith.constant dense<0.000000e+00> : vector<16x16xf32>
    %107 = tpu.matmul %103, %106, %cst_21 {dimension_numbers = #tpu.dot_dimension_numbers<[1], [0], [0], [1], [0, 0, 1, 1], [], []>} : vector<16x8xf32>, vector<8x16xf32>, vector<16x16xf32> -> vector<16x16xf32>
    %108 = arith.addf %107, %3 : vector<16x16xf32>
    %cst_22 = arith.constant dense<0xFF800000> : vector<16xf32>
    %109 = vector.multi_reduction <maximumf>, %108, %cst_22 [1] : vector<16x16xf32> to vector<16xf32>
    %110 = vector.shape_cast %109 : vector<16xf32> to vector<16x1xf32>
    %111 = vector.broadcast %110 : vector<16x1xf32> to vector<16x16xf32>
    %112 = arith.subf %108, %111 : vector<16x16xf32>
    %113 = math.exp %112 : vector<16x16xf32>
    %cst_23 = arith.constant dense<0.000000e+00> : vector<16xf32>
    %114 = vector.multi_reduction <add>, %113, %cst_23 [1] : vector<16x16xf32> to vector<16xf32>
    %115 = vector.shape_cast %114 : vector<16xf32> to vector<16x1xf32>
    %116 = tpu.reciprocal %115 : vector<16x1xf32> -> vector<16x1xf32>
    %117 = vector.broadcast %116 : vector<16x1xf32> to vector<16x16xf32>
    %118 = arith.mulf %113, %117 : vector<16x16xf32>
    %cst_24 = arith.constant dense<0.000000e+00> : vector<16x8xf32>
    %119 = tpu.matmul %118, %105, %cst_24 {dimension_numbers = #tpu.dot_dimension_numbers<[1], [0], [0], [1], [0, 0, 1, 1], [], []>} : vector<16x16xf32>, vector<16x8xf32>, vector<16x8xf32> -> vector<16x8xf32>
    %120 = tpu.concatenate %68, %85, %102, %119 in 1 : vector<16x8xf32>, vector<16x8xf32>, vector<16x8xf32>, vector<16x8xf32> -> vector<16x32xf32>
    %c0_25 = arith.constant 0 : index
    %c0_26 = arith.constant 0 : index
    %c0_27 = arith.constant 0 : index
    %121 = vector.load %arg4[%c0_25, %c0_26, %c0_27] : memref<2x32x32xf32, #tpu.memory_space<vmem>>, vector<1x32x32xf32>
    %122 = vector.shape_cast %121 : vector<1x32x32xf32> to vector<32x32xf32>
    %cst_28 = arith.constant dense<0.000000e+00> : vector<16x32xf32>
    %123 = tpu.matmul %120, %122, %cst_28 {dimension_numbers = #tpu.dot_dimension_numbers<[1], [0], [0], [1], [0, 0, 1, 1], [], []>} : vector<16x32xf32>, vector<32x32xf32>, vector<16x32xf32> -> vector<16x32xf32>
    %124 = vector.broadcast %21 : vector<1x32xf32> to vector<16x32xf32>
    %125 = arith.addf %123, %124 : vector<16x32xf32>
    %126 = arith.addf %11, %125 : vector<16x32xf32>
    %cst_29 = arith.constant dense<0.000000e+00> : vector<16xf32>
    %127 = vector.multi_reduction <add>, %126, %cst_29 [1] : vector<16x32xf32> to vector<16xf32>
    %128 = vector.shape_cast %127 : vector<16xf32> to vector<16x1xf32>
    %cst_30 = arith.constant 3.200000e+01 : f32
    %129 = vector.broadcast %cst_30 : f32 to vector<16x1xf32>
    %130 = arith.divf %128, %129 : vector<16x1xf32>
    %131 = vector.broadcast %130 : vector<16x1xf32> to vector<16x32xf32>
    %132 = arith.subf %126, %131 : vector<16x32xf32>
    %133 = arith.mulf %132, %132 : vector<16x32xf32>
    %cst_31 = arith.constant dense<0.000000e+00> : vector<16xf32>
    %134 = vector.multi_reduction <add>, %133, %cst_31 [1] : vector<16x32xf32> to vector<16xf32>
    %135 = vector.shape_cast %134 : vector<16xf32> to vector<16x1xf32>
    %cst_32 = arith.constant 3.200000e+01 : f32
    %136 = vector.broadcast %cst_32 : f32 to vector<16x1xf32>
    %137 = arith.divf %135, %136 : vector<16x1xf32>
    %138 = vector.broadcast %130 : vector<16x1xf32> to vector<16x32xf32>
    %139 = arith.subf %126, %138 : vector<16x32xf32>
    %cst_33 = arith.constant 9.99999974E-6 : f32
    %140 = vector.broadcast %cst_33 : f32 to vector<16x1xf32>
    %141 = arith.addf %137, %140 : vector<16x1xf32>
    %142 = math.rsqrt %141 : vector<16x1xf32>
    %143 = vector.broadcast %142 : vector<16x1xf32> to vector<16x32xf32>
    %144 = arith.mulf %139, %143 : vector<16x32xf32>
    %145 = vector.broadcast %24 : vector<1x32xf32> to vector<16x32xf32>
    %146 = arith.mulf %144, %145 : vector<16x32xf32>
    %147 = vector.broadcast %25 : vector<1x32xf32> to vector<16x32xf32>
    %148 = arith.addf %146, %147 : vector<16x32xf32>
    %c0_34 = arith.constant 0 : index
    %c0_35 = arith.constant 0 : index
    %c0_36 = arith.constant 0 : index
    %149 = vector.load %arg5[%c0_34, %c0_35, %c0_36] : memref<2x32x64xf32, #tpu.memory_space<vmem>>, vector<1x32x64xf32>
    %150 = vector.shape_cast %149 : vector<1x32x64xf32> to vector<32x64xf32>
    %cst_37 = arith.constant dense<0.000000e+00> : vector<16x64xf32>
    %151 = tpu.matmul %148, %150, %cst_37 {dimension_numbers = #tpu.dot_dimension_numbers<[1], [0], [0], [1], [0, 0, 1, 1], [], []>} : vector<16x32xf32>, vector<32x64xf32>, vector<16x64xf32> -> vector<16x64xf32>
    %152 = vector.broadcast %23 : vector<1x64xf32> to vector<16x64xf32>
    %153 = arith.addf %151, %152 : vector<16x64xf32>
    %cst_38 = arith.constant 0.000000e+00 : f32
    %154 = vector.broadcast %cst_38 : f32 to vector<16x64xf32>
    %155 = arith.maximumf %153, %154 : vector<16x64xf32>
    %c0_39 = arith.constant 0 : index
    %c0_40 = arith.constant 0 : index
    %c0_41 = arith.constant 0 : index
    %156 = vector.load %arg6[%c0_39, %c0_40, %c0_41] : memref<2x64x32xf32, #tpu.memory_space<vmem>>, vector<1x64x32xf32>
    %157 = vector.shape_cast %156 : vector<1x64x32xf32> to vector<64x32xf32>
    %cst_42 = arith.constant dense<0.000000e+00> : vector<16x32xf32>
    %158 = tpu.matmul %155, %157, %cst_42 {dimension_numbers = #tpu.dot_dimension_numbers<[1], [0], [0], [1], [0, 0, 1, 1], [], []>} : vector<16x64xf32>, vector<64x32xf32>, vector<16x32xf32> -> vector<16x32xf32>
    %159 = vector.broadcast %22 : vector<1x32xf32> to vector<16x32xf32>
    %160 = arith.addf %158, %159 : vector<16x32xf32>
    %161 = arith.addf %148, %160 : vector<16x32xf32>
    %cst_43 = arith.constant dense<0.000000e+00> : vector<16xf32>
    %162 = vector.multi_reduction <add>, %161, %cst_43 [1] : vector<16x32xf32> to vector<16xf32>
    %163 = vector.shape_cast %162 : vector<16xf32> to vector<16x1xf32>
    %cst_44 = arith.constant 3.200000e+01 : f32
    %164 = vector.broadcast %cst_44 : f32 to vector<16x1xf32>
    %165 = arith.divf %163, %164 : vector<16x1xf32>
    %166 = vector.broadcast %165 : vector<16x1xf32> to vector<16x32xf32>
    %167 = arith.subf %161, %166 : vector<16x32xf32>
    %168 = arith.mulf %167, %167 : vector<16x32xf32>
    %cst_45 = arith.constant dense<0.000000e+00> : vector<16xf32>
    %169 = vector.multi_reduction <add>, %168, %cst_45 [1] : vector<16x32xf32> to vector<16xf32>
    %170 = vector.shape_cast %169 : vector<16xf32> to vector<16x1xf32>
    %cst_46 = arith.constant 3.200000e+01 : f32
    %171 = vector.broadcast %cst_46 : f32 to vector<16x1xf32>
    %172 = arith.divf %170, %171 : vector<16x1xf32>
    %173 = vector.broadcast %165 : vector<16x1xf32> to vector<16x32xf32>
    %174 = arith.subf %161, %173 : vector<16x32xf32>
    %cst_47 = arith.constant 9.99999974E-6 : f32
    %175 = vector.broadcast %cst_47 : f32 to vector<16x1xf32>
    %176 = arith.addf %172, %175 : vector<16x1xf32>
    %177 = math.rsqrt %176 : vector<16x1xf32>
    %178 = vector.broadcast %177 : vector<16x1xf32> to vector<16x32xf32>
    %179 = arith.mulf %174, %178 : vector<16x32xf32>
    %180 = vector.broadcast %26 : vector<1x32xf32> to vector<16x32xf32>
    %181 = arith.mulf %179, %180 : vector<16x32xf32>
    %182 = vector.broadcast %27 : vector<1x32xf32> to vector<16x32xf32>
    %183 = arith.addf %181, %182 : vector<16x32xf32>
    %184 = vector.extract_strided_slice %0 {offsets = [20, 0], sizes = [1, 128], strides = [1, 1]} : vector<24x128xf32> to vector<1x128xf32>
    %185 = vector.extract_strided_slice %0 {offsets = [21, 0], sizes = [1, 128], strides = [1, 1]} : vector<24x128xf32> to vector<1x128xf32>
    %186 = vector.extract_strided_slice %0 {offsets = [22, 0], sizes = [1, 128], strides = [1, 1]} : vector<24x128xf32> to vector<1x128xf32>
    %187 = vector.extract_strided_slice %0 {offsets = [23, 0], sizes = [1, 128], strides = [1, 1]} : vector<24x128xf32> to vector<1x128xf32>
    %188 = vector.extract_strided_slice %184 {offsets = [0, 0], sizes = [1, 32], strides = [1, 1]} : vector<1x128xf32> to vector<1x32xf32>
    %189 = vector.extract_strided_slice %184 {offsets = [0, 32], sizes = [1, 32], strides = [1, 1]} : vector<1x128xf32> to vector<1x32xf32>
    %190 = vector.extract_strided_slice %184 {offsets = [0, 64], sizes = [1, 32], strides = [1, 1]} : vector<1x128xf32> to vector<1x32xf32>
    %191 = vector.extract_strided_slice %184 {offsets = [0, 96], sizes = [1, 32], strides = [1, 1]} : vector<1x128xf32> to vector<1x32xf32>
    %192 = vector.extract_strided_slice %185 {offsets = [0, 0], sizes = [1, 32], strides = [1, 1]} : vector<1x128xf32> to vector<1x32xf32>
    %193 = vector.extract_strided_slice %185 {offsets = [0, 32], sizes = [1, 32], strides = [1, 1]} : vector<1x128xf32> to vector<1x32xf32>
    %194 = vector.extract_strided_slice %185 {offsets = [0, 64], sizes = [1, 32], strides = [1, 1]} : vector<1x128xf32> to vector<1x32xf32>
    %195 = vector.extract_strided_slice %186 {offsets = [0, 0], sizes = [1, 64], strides = [1, 1]} : vector<1x128xf32> to vector<1x64xf32>
    %196 = vector.extract_strided_slice %187 {offsets = [0, 0], sizes = [1, 32], strides = [1, 1]} : vector<1x128xf32> to vector<1x32xf32>
    %197 = vector.extract_strided_slice %187 {offsets = [0, 32], sizes = [1, 32], strides = [1, 1]} : vector<1x128xf32> to vector<1x32xf32>
    %198 = vector.extract_strided_slice %187 {offsets = [0, 64], sizes = [1, 32], strides = [1, 1]} : vector<1x128xf32> to vector<1x32xf32>
    %199 = vector.extract_strided_slice %187 {offsets = [0, 96], sizes = [1, 32], strides = [1, 1]} : vector<1x128xf32> to vector<1x32xf32>
    %c1 = arith.constant 1 : index
    %c0_48 = arith.constant 0 : index
    %c0_49 = arith.constant 0 : index
    %200 = vector.load %arg3[%c1, %c0_48, %c0_49] : memref<2x32x160xf32, #tpu.memory_space<vmem>>, vector<1x32x160xf32>
    %201 = vector.shape_cast %200 : vector<1x32x160xf32> to vector<32x160xf32>
    %cst_50 = arith.constant dense<0.000000e+00> : vector<16x160xf32>
    %202 = tpu.matmul %183, %201, %cst_50 {dimension_numbers = #tpu.dot_dimension_numbers<[1], [0], [0], [1], [0, 0, 1, 1], [], []>} : vector<16x32xf32>, vector<32x160xf32>, vector<16x160xf32> -> vector<16x160xf32>
    %203 = vector.extract_strided_slice %202 {offsets = [0, 0], sizes = [16, 32], strides = [1, 1]} : vector<16x160xf32> to vector<16x32xf32>
    %204 = vector.broadcast %188 : vector<1x32xf32> to vector<16x32xf32>
    %205 = arith.addf %203, %204 : vector<16x32xf32>
    %206 = arith.mulf %205, %1 : vector<16x32xf32>
    %207 = vector.extract_strided_slice %202 {offsets = [0, 32], sizes = [16, 32], strides = [1, 1]} : vector<16x160xf32> to vector<16x32xf32>
    %208 = vector.broadcast %189 : vector<1x32xf32> to vector<16x32xf32>
    %209 = arith.addf %207, %208 : vector<16x32xf32>
    %210 = arith.mulf %209, %2 : vector<16x32xf32>
    %211 = arith.addf %206, %210 : vector<16x32xf32>
    %212 = vector.extract_strided_slice %202 {offsets = [0, 64], sizes = [16, 32], strides = [1, 1]} : vector<16x160xf32> to vector<16x32xf32>
    %213 = vector.broadcast %190 : vector<1x32xf32> to vector<16x32xf32>
    %214 = arith.addf %212, %213 : vector<16x32xf32>
    %215 = arith.mulf %214, %1 : vector<16x32xf32>
    %216 = vector.extract_strided_slice %202 {offsets = [0, 96], sizes = [16, 32], strides = [1, 1]} : vector<16x160xf32> to vector<16x32xf32>
    %217 = vector.broadcast %191 : vector<1x32xf32> to vector<16x32xf32>
    %218 = arith.addf %216, %217 : vector<16x32xf32>
    %219 = arith.mulf %218, %2 : vector<16x32xf32>
    %220 = arith.addf %215, %219 : vector<16x32xf32>
    %221 = vector.extract_strided_slice %202 {offsets = [0, 128], sizes = [16, 32], strides = [1, 1]} : vector<16x160xf32> to vector<16x32xf32>
    %222 = vector.broadcast %192 : vector<1x32xf32> to vector<16x32xf32>
    %223 = arith.addf %221, %222 : vector<16x32xf32>
    %224 = vector.extract_strided_slice %211 {offsets = [0, 0], sizes = [16, 8], strides = [1, 1]} : vector<16x32xf32> to vector<16x8xf32>
    %225 = vector.extract_strided_slice %220 {offsets = [0, 0], sizes = [16, 8], strides = [1, 1]} : vector<16x32xf32> to vector<16x8xf32>
    %226 = vector.extract_strided_slice %223 {offsets = [0, 0], sizes = [16, 8], strides = [1, 1]} : vector<16x32xf32> to vector<16x8xf32>
    %227 = tpu.transpose %225, [1, 0] : vector<16x8xf32> -> vector<8x16xf32>
    %cst_51 = arith.constant dense<0.000000e+00> : vector<16x16xf32>
    %228 = tpu.matmul %224, %227, %cst_51 {dimension_numbers = #tpu.dot_dimension_numbers<[1], [0], [0], [1], [0, 0, 1, 1], [], []>} : vector<16x8xf32>, vector<8x16xf32>, vector<16x16xf32> -> vector<16x16xf32>
    %229 = arith.addf %228, %3 : vector<16x16xf32>
    %cst_52 = arith.constant dense<0xFF800000> : vector<16xf32>
    %230 = vector.multi_reduction <maximumf>, %229, %cst_52 [1] : vector<16x16xf32> to vector<16xf32>
    %231 = vector.shape_cast %230 : vector<16xf32> to vector<16x1xf32>
    %232 = vector.broadcast %231 : vector<16x1xf32> to vector<16x16xf32>
    %233 = arith.subf %229, %232 : vector<16x16xf32>
    %234 = math.exp %233 : vector<16x16xf32>
    %cst_53 = arith.constant dense<0.000000e+00> : vector<16xf32>
    %235 = vector.multi_reduction <add>, %234, %cst_53 [1] : vector<16x16xf32> to vector<16xf32>
    %236 = vector.shape_cast %235 : vector<16xf32> to vector<16x1xf32>
    %237 = tpu.reciprocal %236 : vector<16x1xf32> -> vector<16x1xf32>
    %238 = vector.broadcast %237 : vector<16x1xf32> to vector<16x16xf32>
    %239 = arith.mulf %234, %238 : vector<16x16xf32>
    %cst_54 = arith.constant dense<0.000000e+00> : vector<16x8xf32>
    %240 = tpu.matmul %239, %226, %cst_54 {dimension_numbers = #tpu.dot_dimension_numbers<[1], [0], [0], [1], [0, 0, 1, 1], [], []>} : vector<16x16xf32>, vector<16x8xf32>, vector<16x8xf32> -> vector<16x8xf32>
    %241 = vector.extract_strided_slice %211 {offsets = [0, 8], sizes = [16, 8], strides = [1, 1]} : vector<16x32xf32> to vector<16x8xf32>
    %242 = vector.extract_strided_slice %220 {offsets = [0, 8], sizes = [16, 8], strides = [1, 1]} : vector<16x32xf32> to vector<16x8xf32>
    %243 = vector.extract_strided_slice %223 {offsets = [0, 8], sizes = [16, 8], strides = [1, 1]} : vector<16x32xf32> to vector<16x8xf32>
    %244 = tpu.transpose %242, [1, 0] : vector<16x8xf32> -> vector<8x16xf32>
    %cst_55 = arith.constant dense<0.000000e+00> : vector<16x16xf32>
    %245 = tpu.matmul %241, %244, %cst_55 {dimension_numbers = #tpu.dot_dimension_numbers<[1], [0], [0], [1], [0, 0, 1, 1], [], []>} : vector<16x8xf32>, vector<8x16xf32>, vector<16x16xf32> -> vector<16x16xf32>
    %246 = arith.addf %245, %3 : vector<16x16xf32>
    %cst_56 = arith.constant dense<0xFF800000> : vector<16xf32>
    %247 = vector.multi_reduction <maximumf>, %246, %cst_56 [1] : vector<16x16xf32> to vector<16xf32>
    %248 = vector.shape_cast %247 : vector<16xf32> to vector<16x1xf32>
    %249 = vector.broadcast %248 : vector<16x1xf32> to vector<16x16xf32>
    %250 = arith.subf %246, %249 : vector<16x16xf32>
    %251 = math.exp %250 : vector<16x16xf32>
    %cst_57 = arith.constant dense<0.000000e+00> : vector<16xf32>
    %252 = vector.multi_reduction <add>, %251, %cst_57 [1] : vector<16x16xf32> to vector<16xf32>
    %253 = vector.shape_cast %252 : vector<16xf32> to vector<16x1xf32>
    %254 = tpu.reciprocal %253 : vector<16x1xf32> -> vector<16x1xf32>
    %255 = vector.broadcast %254 : vector<16x1xf32> to vector<16x16xf32>
    %256 = arith.mulf %251, %255 : vector<16x16xf32>
    %cst_58 = arith.constant dense<0.000000e+00> : vector<16x8xf32>
    %257 = tpu.matmul %256, %243, %cst_58 {dimension_numbers = #tpu.dot_dimension_numbers<[1], [0], [0], [1], [0, 0, 1, 1], [], []>} : vector<16x16xf32>, vector<16x8xf32>, vector<16x8xf32> -> vector<16x8xf32>
    %258 = vector.extract_strided_slice %211 {offsets = [0, 16], sizes = [16, 8], strides = [1, 1]} : vector<16x32xf32> to vector<16x8xf32>
    %259 = vector.extract_strided_slice %220 {offsets = [0, 16], sizes = [16, 8], strides = [1, 1]} : vector<16x32xf32> to vector<16x8xf32>
    %260 = vector.extract_strided_slice %223 {offsets = [0, 16], sizes = [16, 8], strides = [1, 1]} : vector<16x32xf32> to vector<16x8xf32>
    %261 = tpu.transpose %259, [1, 0] : vector<16x8xf32> -> vector<8x16xf32>
    %cst_59 = arith.constant dense<0.000000e+00> : vector<16x16xf32>
    %262 = tpu.matmul %258, %261, %cst_59 {dimension_numbers = #tpu.dot_dimension_numbers<[1], [0], [0], [1], [0, 0, 1, 1], [], []>} : vector<16x8xf32>, vector<8x16xf32>, vector<16x16xf32> -> vector<16x16xf32>
    %263 = arith.addf %262, %3 : vector<16x16xf32>
    %cst_60 = arith.constant dense<0xFF800000> : vector<16xf32>
    %264 = vector.multi_reduction <maximumf>, %263, %cst_60 [1] : vector<16x16xf32> to vector<16xf32>
    %265 = vector.shape_cast %264 : vector<16xf32> to vector<16x1xf32>
    %266 = vector.broadcast %265 : vector<16x1xf32> to vector<16x16xf32>
    %267 = arith.subf %263, %266 : vector<16x16xf32>
    %268 = math.exp %267 : vector<16x16xf32>
    %cst_61 = arith.constant dense<0.000000e+00> : vector<16xf32>
    %269 = vector.multi_reduction <add>, %268, %cst_61 [1] : vector<16x16xf32> to vector<16xf32>
    %270 = vector.shape_cast %269 : vector<16xf32> to vector<16x1xf32>
    %271 = tpu.reciprocal %270 : vector<16x1xf32> -> vector<16x1xf32>
    %272 = vector.broadcast %271 : vector<16x1xf32> to vector<16x16xf32>
    %273 = arith.mulf %268, %272 : vector<16x16xf32>
    %cst_62 = arith.constant dense<0.000000e+00> : vector<16x8xf32>
    %274 = tpu.matmul %273, %260, %cst_62 {dimension_numbers = #tpu.dot_dimension_numbers<[1], [0], [0], [1], [0, 0, 1, 1], [], []>} : vector<16x16xf32>, vector<16x8xf32>, vector<16x8xf32> -> vector<16x8xf32>
    %275 = vector.extract_strided_slice %211 {offsets = [0, 24], sizes = [16, 8], strides = [1, 1]} : vector<16x32xf32> to vector<16x8xf32>
    %276 = vector.extract_strided_slice %220 {offsets = [0, 24], sizes = [16, 8], strides = [1, 1]} : vector<16x32xf32> to vector<16x8xf32>
    %277 = vector.extract_strided_slice %223 {offsets = [0, 24], sizes = [16, 8], strides = [1, 1]} : vector<16x32xf32> to vector<16x8xf32>
    %278 = tpu.transpose %276, [1, 0] : vector<16x8xf32> -> vector<8x16xf32>
    %cst_63 = arith.constant dense<0.000000e+00> : vector<16x16xf32>
    %279 = tpu.matmul %275, %278, %cst_63 {dimension_numbers = #tpu.dot_dimension_numbers<[1], [0], [0], [1], [0, 0, 1, 1], [], []>} : vector<16x8xf32>, vector<8x16xf32>, vector<16x16xf32> -> vector<16x16xf32>
    %280 = arith.addf %279, %3 : vector<16x16xf32>
    %cst_64 = arith.constant dense<0xFF800000> : vector<16xf32>
    %281 = vector.multi_reduction <maximumf>, %280, %cst_64 [1] : vector<16x16xf32> to vector<16xf32>
    %282 = vector.shape_cast %281 : vector<16xf32> to vector<16x1xf32>
    %283 = vector.broadcast %282 : vector<16x1xf32> to vector<16x16xf32>
    %284 = arith.subf %280, %283 : vector<16x16xf32>
    %285 = math.exp %284 : vector<16x16xf32>
    %cst_65 = arith.constant dense<0.000000e+00> : vector<16xf32>
    %286 = vector.multi_reduction <add>, %285, %cst_65 [1] : vector<16x16xf32> to vector<16xf32>
    %287 = vector.shape_cast %286 : vector<16xf32> to vector<16x1xf32>
    %288 = tpu.reciprocal %287 : vector<16x1xf32> -> vector<16x1xf32>
    %289 = vector.broadcast %288 : vector<16x1xf32> to vector<16x16xf32>
    %290 = arith.mulf %285, %289 : vector<16x16xf32>
    %cst_66 = arith.constant dense<0.000000e+00> : vector<16x8xf32>
    %291 = tpu.matmul %290, %277, %cst_66 {dimension_numbers = #tpu.dot_dimension_numbers<[1], [0], [0], [1], [0, 0, 1, 1], [], []>} : vector<16x16xf32>, vector<16x8xf32>, vector<16x8xf32> -> vector<16x8xf32>
    %292 = tpu.concatenate %240, %257, %274, %291 in 1 : vector<16x8xf32>, vector<16x8xf32>, vector<16x8xf32>, vector<16x8xf32> -> vector<16x32xf32>
    %c1_67 = arith.constant 1 : index
    %c0_68 = arith.constant 0 : index
    %c0_69 = arith.constant 0 : index
    %293 = vector.load %arg4[%c1_67, %c0_68, %c0_69] : memref<2x32x32xf32, #tpu.memory_space<vmem>>, vector<1x32x32xf32>
    %294 = vector.shape_cast %293 : vector<1x32x32xf32> to vector<32x32xf32>
    %cst_70 = arith.constant dense<0.000000e+00> : vector<16x32xf32>
    %295 = tpu.matmul %292, %294, %cst_70 {dimension_numbers = #tpu.dot_dimension_numbers<[1], [0], [0], [1], [0, 0, 1, 1], [], []>} : vector<16x32xf32>, vector<32x32xf32>, vector<16x32xf32> -> vector<16x32xf32>
    %296 = vector.broadcast %193 : vector<1x32xf32> to vector<16x32xf32>
    %297 = arith.addf %295, %296 : vector<16x32xf32>
    %298 = arith.addf %183, %297 : vector<16x32xf32>
    %cst_71 = arith.constant dense<0.000000e+00> : vector<16xf32>
    %299 = vector.multi_reduction <add>, %298, %cst_71 [1] : vector<16x32xf32> to vector<16xf32>
    %300 = vector.shape_cast %299 : vector<16xf32> to vector<16x1xf32>
    %cst_72 = arith.constant 3.200000e+01 : f32
    %301 = vector.broadcast %cst_72 : f32 to vector<16x1xf32>
    %302 = arith.divf %300, %301 : vector<16x1xf32>
    %303 = vector.broadcast %302 : vector<16x1xf32> to vector<16x32xf32>
    %304 = arith.subf %298, %303 : vector<16x32xf32>
    %305 = arith.mulf %304, %304 : vector<16x32xf32>
    %cst_73 = arith.constant dense<0.000000e+00> : vector<16xf32>
    %306 = vector.multi_reduction <add>, %305, %cst_73 [1] : vector<16x32xf32> to vector<16xf32>
    %307 = vector.shape_cast %306 : vector<16xf32> to vector<16x1xf32>
    %cst_74 = arith.constant 3.200000e+01 : f32
    %308 = vector.broadcast %cst_74 : f32 to vector<16x1xf32>
    %309 = arith.divf %307, %308 : vector<16x1xf32>
    %310 = vector.broadcast %302 : vector<16x1xf32> to vector<16x32xf32>
    %311 = arith.subf %298, %310 : vector<16x32xf32>
    %cst_75 = arith.constant 9.99999974E-6 : f32
    %312 = vector.broadcast %cst_75 : f32 to vector<16x1xf32>
    %313 = arith.addf %309, %312 : vector<16x1xf32>
    %314 = math.rsqrt %313 : vector<16x1xf32>
    %315 = vector.broadcast %314 : vector<16x1xf32> to vector<16x32xf32>
    %316 = arith.mulf %311, %315 : vector<16x32xf32>
    %317 = vector.broadcast %196 : vector<1x32xf32> to vector<16x32xf32>
    %318 = arith.mulf %316, %317 : vector<16x32xf32>
    %319 = vector.broadcast %197 : vector<1x32xf32> to vector<16x32xf32>
    %320 = arith.addf %318, %319 : vector<16x32xf32>
    %c1_76 = arith.constant 1 : index
    %c0_77 = arith.constant 0 : index
    %c0_78 = arith.constant 0 : index
    %321 = vector.load %arg5[%c1_76, %c0_77, %c0_78] : memref<2x32x64xf32, #tpu.memory_space<vmem>>, vector<1x32x64xf32>
    %322 = vector.shape_cast %321 : vector<1x32x64xf32> to vector<32x64xf32>
    %cst_79 = arith.constant dense<0.000000e+00> : vector<16x64xf32>
    %323 = tpu.matmul %320, %322, %cst_79 {dimension_numbers = #tpu.dot_dimension_numbers<[1], [0], [0], [1], [0, 0, 1, 1], [], []>} : vector<16x32xf32>, vector<32x64xf32>, vector<16x64xf32> -> vector<16x64xf32>
    %324 = vector.broadcast %195 : vector<1x64xf32> to vector<16x64xf32>
    %325 = arith.addf %323, %324 : vector<16x64xf32>
    %cst_80 = arith.constant 0.000000e+00 : f32
    %326 = vector.broadcast %cst_80 : f32 to vector<16x64xf32>
    %327 = arith.maximumf %325, %326 : vector<16x64xf32>
    %c1_81 = arith.constant 1 : index
    %c0_82 = arith.constant 0 : index
    %c0_83 = arith.constant 0 : index
    %328 = vector.load %arg6[%c1_81, %c0_82, %c0_83] : memref<2x64x32xf32, #tpu.memory_space<vmem>>, vector<1x64x32xf32>
    %329 = vector.shape_cast %328 : vector<1x64x32xf32> to vector<64x32xf32>
    %cst_84 = arith.constant dense<0.000000e+00> : vector<16x32xf32>
    %330 = tpu.matmul %327, %329, %cst_84 {dimension_numbers = #tpu.dot_dimension_numbers<[1], [0], [0], [1], [0, 0, 1, 1], [], []>} : vector<16x64xf32>, vector<64x32xf32>, vector<16x32xf32> -> vector<16x32xf32>
    %331 = vector.broadcast %194 : vector<1x32xf32> to vector<16x32xf32>
    %332 = arith.addf %330, %331 : vector<16x32xf32>
    %333 = arith.addf %320, %332 : vector<16x32xf32>
    %cst_85 = arith.constant dense<0.000000e+00> : vector<16xf32>
    %334 = vector.multi_reduction <add>, %333, %cst_85 [1] : vector<16x32xf32> to vector<16xf32>
    %335 = vector.shape_cast %334 : vector<16xf32> to vector<16x1xf32>
    %cst_86 = arith.constant 3.200000e+01 : f32
    %336 = vector.broadcast %cst_86 : f32 to vector<16x1xf32>
    %337 = arith.divf %335, %336 : vector<16x1xf32>
    %338 = vector.broadcast %337 : vector<16x1xf32> to vector<16x32xf32>
    %339 = arith.subf %333, %338 : vector<16x32xf32>
    %340 = arith.mulf %339, %339 : vector<16x32xf32>
    %cst_87 = arith.constant dense<0.000000e+00> : vector<16xf32>
    %341 = vector.multi_reduction <add>, %340, %cst_87 [1] : vector<16x32xf32> to vector<16xf32>
    %342 = vector.shape_cast %341 : vector<16xf32> to vector<16x1xf32>
    %cst_88 = arith.constant 3.200000e+01 : f32
    %343 = vector.broadcast %cst_88 : f32 to vector<16x1xf32>
    %344 = arith.divf %342, %343 : vector<16x1xf32>
    %345 = vector.broadcast %337 : vector<16x1xf32> to vector<16x32xf32>
    %346 = arith.subf %333, %345 : vector<16x32xf32>
    %cst_89 = arith.constant 9.99999974E-6 : f32
    %347 = vector.broadcast %cst_89 : f32 to vector<16x1xf32>
    %348 = arith.addf %344, %347 : vector<16x1xf32>
    %349 = math.rsqrt %348 : vector<16x1xf32>
    %350 = vector.broadcast %349 : vector<16x1xf32> to vector<16x32xf32>
    %351 = arith.mulf %346, %350 : vector<16x32xf32>
    %352 = vector.broadcast %198 : vector<1x32xf32> to vector<16x32xf32>
    %353 = arith.mulf %351, %352 : vector<16x32xf32>
    %354 = vector.broadcast %199 : vector<1x32xf32> to vector<16x32xf32>
    %355 = arith.addf %353, %354 : vector<16x32xf32>
    %cst_90 = arith.constant dense<0.000000e+00> : vector<16x128xf32>
    %356 = tpu.matmul %355, %10, %cst_90 {dimension_numbers = #tpu.dot_dimension_numbers<[1], [1], [0], [0], [0, 0, 1, 0], [], []>} : vector<16x32xf32>, vector<128x32xf32>, vector<16x128xf32> -> vector<16x128xf32>
    %c0_91 = arith.constant 0 : index
    %c0_92 = arith.constant 0 : index
    %357 = vector.load %arg7[%c0_91, %c0_92] : memref<16x128xf32, #tpu.memory_space<vmem>>, vector<16x128xf32>
    tpu.vector_store %arg7[%c0_91, %c0_92], %356 {strides = array<i32>} : memref<16x128xf32, #tpu.memory_space<vmem>>, vector<16x128xf32>,
    return
  }
}

</mosaic_0001>

<bundles_post_ra>
// kernel: tpu_custom_call.1
= control target key start
LH: loop header
LB: loop body
LE: loop exit
PB: predicated region body
PF: predicated region fallthrough
CT: control target
= control target key end

     0   :  { %v3859_v2 = vmov 0   ;;  %s4597_s0 = inlined_call_operand.vmem [shape: s32[16,1], index: 0, kind: input, shape index: {}]   ;;  %s4598_s1 = inlined_call_operand.vmem [shape: f32[24,128], index: 1, kind: input, shape index: {}]   ;;  %s4599_s2 = inlined_call_operand.vmem [shape: f32[128,32], index: 2, kind: input, shape index: {}]   ;;  %s4600_s3 = inlined_call_operand.vmem [shape: f32[2,32,160], index: 3, kind: input, shape index: {}]   ;;  %s4601_s4 = inlined_call_operand.vmem [shape: f32[2,32,32], index: 4, kind: input, shape index: {}]   ;;  %s4602_s5 = inlined_call_operand.vmem [shape: f32[2,32,64], index: 5, kind: input, shape index: {}]   ;;  %s4603_s6 = inlined_call_operand.vmem [shape: f32[2,64,32], index: 6, kind: input, shape index: {}]   ;;  %s4604_s7 = inlined_call_operand.hbm [shape: f32[16,128], index: 7, kind: output, shape index: {}]  }
   0x1   :  { %v30_v0 = vld [vmem:[%s4597_s0] sm:$0xff]  ;;  %3683 = vset.pattern.permute.xlu0 %v3859_v2  ;;  %v47_v3 = vld [vmem:[%s4599_s2 + $0x8] sm:$0xff]  ;;  %v48_v4 = vld [vmem:[%s4599_s2 + $0x10] sm:$0xff] }
   0x2   :  { %v46_v1 = vld [vmem:[%s4599_s2] sm:$0xff]  ;;  %v49_v5 = vld [vmem:[%s4599_s2 + $0x18] sm:$0xff]  ;;  %35 = vperm.xlu0 %3683, %v30_v0   ;;  %v31_v8 = vld [vmem:[%s4597_s0 + $0x8] sm:$0xff] }
   0x3   :  { %v3931_v6 = vpack.c.bf16 %v47_v3, %v46_v1  ;;  %v3933_v7 = vpack.c.bf16 %v49_v5, %v48_v4  ;;  %v50_v9 = vld [vmem:[%s4599_s2 + $0x20] sm:$0xff]  ;;  %v51_v10 = vld [vmem:[%s4599_s2 + $0x28] sm:$0xff] }
   0x4   :  { %v3947_v11 = vpack.c.bf16 %v51_v10, %v50_v9 }
   0x5   :  { %3427 = vmatprep.subr.bf16.mxu0 %v3931_v6 }
   0x6   :  { %3429 = vmatpush3.bf16.msra.mxu0 %v3931_v6  ;;  %38 = vperm.xlu0 %3683, %v31_v8  }
   0x7   :  { %3431 = vmatprep.subr.bf16.mxu0 %v3933_v7 }
   0x8   :  { %12 = vsyncpa [#allocation3], 0  ;;  %v52_v12 = vld [vmem:[%s4599_s2 + $0x30] sm:$0xff]  ;;  %v53_v13 = vld [vmem:[%s4599_s2 + $0x38] sm:$0xff]  ;;  %v32_v30 = vlaneseq  ;;  %v3860_v37 = vmov 1.0   ;;  %v3861_v44 = vmov 0.0  }
   0x9   :  { %v3957_v14 = vpack.c.bf16 %v53_v13, %v52_v12  ;;  %v54_v15 = vld [vmem:[%s4599_s2 + $0x40] sm:$0xff]  ;;  %v55_v16 = vld [vmem:[%s4599_s2 + $0x48] sm:$0xff]  ;;  %v56_v18 = vld [vmem:[%s4599_s2 + $0x50] sm:$0xff]  ;;  %s3862_s29 = smov 64   ;;  %vm145_vm2 = vcmask 261120   ;;  %s3863_s11 = smov 96  }
   0xa   :  { %3433 = vmatpush3.bf16.msra.mxu0 %v3933_v7  ;;  %v3967_v17 = vpack.c.bf16 %v55_v16, %v54_v15  ;;  %v57_v19 = vld [vmem:[%s4599_s2 + $0x58] sm:$0xff]  ;;  %v58_v21 = vld [vmem:[%s4599_s2 + $0x60] sm:$0xff]  ;;  %v59_v22 = vld [vmem:[%s4599_s2 + $0x68] sm:$0xff]  ;;  %v33_v31 = vand.u32 127, %v32_v30  ;;  %v4050_v49 = vshrl.u32 %v32_v30, 7  ;;  %vm279_vm3 = vcmask 64512  }
   0xb   :  { %3435 = vmatprep.subr.bf16.mxu0 %v3947_v11  ;;  %v3977_v20 = vpack.c.bf16 %v57_v19, %v56_v18  ;;  %v3987_v23 = vpack.c.bf16 %v59_v22, %v58_v21  ;;  %v60_v24 = vld [vmem:[%s4599_s2 + $0x70] sm:$0xff]  ;;  %v61_v25 = vld [vmem:[%s4599_s2 + $0x78] sm:$0xff]  ;;  %v138_v27 = vld [vmem:[%s4600_s3 + $0x8] sm:$0xff]  ;;  %s3864_s12 = smov 56   ;;  %s3865_s13 = smov 48   ;;  %vm365_vm5 = vcmask 130048  }
   0xc   :  { %v3997_v26 = vpack.c.bf16 %v61_v25, %v60_v24  ;;  %v140_v28 = vld [vmem:[%s4600_s3 + $0x18] sm:$0xff]  ;;  %v137_v33 = vld [vmem:[%s4600_s3] sm:$0xff]  ;;  %v139_v34 = vld [vmem:[%s4600_s3 + $0x10] sm:$0xff]  ;;  %v231_v50 = vsub.s32 0, %v4050_v49  ;;  %v269_v53 = vsub.s32 1, %v4050_v49  ;;  %s3866_s14 = smov 120  }
   0xd   :  { %v3458_v29 = vpack.c.bf16 %v140_v28, %v138_v27  ;;  %v142_v35 = vld [vmem:[%s4600_s3 + $0x28] sm:$0xff]  ;;  %v144_v36 = vld [vmem:[%s4600_s3 + $0x38] sm:$0xff]  ;;  %v3460_v38 = vpack.c.bf16 %v139_v34, %v137_v33  ;;  %v141_v41 = vld [vmem:[%s4600_s3 + $0x20] sm:$0xff]  ;;  %s3867_s15 = smov 112   ;;  %s3868_s16 = smov 40   ;;  %vm1099_vm6 = vcmask 195584  }
   0xe   :  { %3437 = vmatpush3.bf16.msra.mxu0 %v3947_v11  ;;  %v3462_v40 = vpack.c.bf16 %v144_v36, %v142_v35  ;;  %v143_v42 = vld [vmem:[%s4600_s3 + $0x30] sm:$0xff]  ;;  %v4030_v45 = vld [vmem:[%s4598_s1] sm:$0xff]  ;;  %v4037_v46 = vld [vmem:[%s4598_s1 + $0x8] sm:$0xff]  ;;  %s3869_s2 = smov 104   ;;  %s3870_s17 = smov 8   ;;  %vm1334_vm7 = vcmask 523264  }
   0xf   :  { %3439 = vmatprep.subr.bf16.mxu0 %v3957_v14  ;;  %v3464_v43 = vpack.c.bf16 %v143_v42, %v141_v41  ;;  %249 = vrot.lane.b32.xlu1 %v4030_v45, %s3862_s29  ;;  %v4056_v51 = vld [vmem:[%s4598_s1 + $0x10] sm:$0xff]  ;;  %vm4103_vm4 = vmpackc.low %vm279_vm3, %vm279_vm3  ;;  %s3871_s0 = smov 16   ;;  %s3872_s26 = smov 24  }
  0x10   :  { %v232_v52 = vrot.slane %v4056_v51, %v231_v50  ;;  %v4063_v58 = vrot.slane %v4056_v51, %v269_v53  ;;  %s3873_s9 = smov 32   ;;  %vm4524_vm8 = vmpackc.low %vm145_vm2, %vm145_vm2 }
  0x12   :  { %3441 = vmatpush3.bf16.msra.mxu0 %v3957_v14 }
  0x13   :  { %3443 = vmatprep.subr.bf16.mxu0 %v3967_v17  ;;  %251 = vrot.lane.b32.xlu1 %v4037_v46, %s3862_s29 }
  0x16   :  { %3445 = vmatpush3.bf16.msra.mxu0 %v3967_v17 }
  0x17   :  { %3447 = vmatprep.subr.bf16.mxu0 %v3977_v20 }
  0x1a   :  { %3449 = vmatpush3.bf16.msra.mxu0 %v3977_v20 }
  0x1b   :  { %3451 = vmatprep.subr.bf16.mxu0 %v3987_v23 }
  0x1e   :  { %3453 = vmatpush3.bf16.msra.mxu0 %v3987_v23 }
  0x1f   :  { %3455 = vmatprep.subr.bf16.mxu0 %v3997_v26 }
  0x22   :  { %3457 = vmatpush3.bf16.msra.mxu0 %v3997_v26 }
  0x23   :  { %3459 = vmatprep.subr.bf16.mxu0 %v3458_v29 }
  0x81   :  { %v36_v32 = vpop.permute.xlu0 %35  ;;  %v4060_v54 = vpop.permute.xlu1 %249 }
  0x82   :  { %vm40_vm0 = vcmp.eq.s32.totalorder %v36_v32, %v33_v31 }
  0x83   :  { %3194 = vmatprep.mubr.msk.f32.mxu0 %vm40_vm0, %v3860_v37 }
  0x85   :  { %v39_v39 = vpop.permute.xlu0 %38  ;;  %v4066_v61 = vpop.permute.xlu1 %251 }
  0x86   :  { %vm41_vm1 = vcmp.eq.s32.totalorder %v39_v39, %v33_v31 }
  0x87   :  { %3195 = vmatmul.mubr.msk.f32.vlgmr.msra.gmra.mrb[0].mxu0 %vm41_vm1, %v3860_v37 }
  0x88   :  { %3461 = vmatpush1.bf16.msra.mxu0 %v3460_v38  ;;  %216 = vmatprep.mubr.f32.mxu0 %v3861_v44 }
  0x89   :  { %3463 = vmatprep.subr.bf16.mxu0 %v3462_v40 }
  0x8c   :  { %3465 = vmatpush1.bf16.msra.mxu0 %v3464_v43 }
 0x15a   :  { %v4041_v47 = vpop.f32.mrb[0].mxu0 }
 0x15b   :  { %v4043_v48 = vpop.f32.mrb[1].mxu0 }
 0x15c   :  { %2912 = vmatmul.mubr.msk.f32.vlgmr.msra.gmra.mrb[2].mxu0 %vm145_vm2, %v4043_v48 }
 0x15d   :  { %222 = vmatprep.mubr.f32.mxu0 %v3861_v44 }
 0x160   :  { %2913 = vmatmul.mubr.msk.f32.gmra.mrb[4].mxu0 %vm145_vm2, %v4041_v47 }
 0x22f   :  { %v218_v55 = vpop.f32.mrb[2].mxu0 }
 0x230   :  { %v233_v56 = vadd.f32 %v232_v52, %v218_v55  ;;  %v220_v57 = vpop.f32.mrb[3].mxu0 }
 0x231   :  { %v271_v0 = vadd.f32 %v4063_v58, %v220_v57 }
 0x232   :  { %v255_v59 = vmul.f32 %v4060_v54, %v233_v56  ;;  %v235_v2 = vmul.f32 %v233_v56, %v4030_v45 }
 0x233   :  { %v224_v60 = vpop.f32.mrb[4].mxu0 }
 0x234   :  { %v234_v62 = vadd.f32 %v232_v52, %v224_v60  ;;  %v226_v63 = vpop.f32.mrb[5].mxu0  ;;  %259 = vrot.lane.b32.xlu0 %v255_v59, %s3863_s11 }
 0x235   :  { %v272_v1 = vadd.f32 %v4063_v58, %v226_v63 }
 0x236   :  { %v256_v3 = vmul.f32 %v4066_v61, %v234_v62  ;;  %v236_v8 = vmul.f32 %v234_v62, %v4037_v46 }
 0x237   :  { %v3472_v4 = vpack.c.bf16 %v272_v1, %v271_v0  ;;  %v4073_v5 = vpack.i.bf16 %v272_v1, %v271_v0 }
 0x238   :  { %261 = vrot.lane.b32.xlu1 %v256_v3, %s3863_s11  ;;  %239 = vrot.lane.b32.xlu0 %v235_v2, %s3863_s11 }
 0x239   :  { %3473 = vmatprep.subr.bf16.mxu1 %v3472_v4 }
 0x23a   :  { %3475 = vmatpush3.bf16.msra.mxu1 %v3472_v4 }
 0x23c   :  { %241 = vrot.lane.b32.xlu1 %v236_v8, %s3863_s11 }
 0x2a6   :  { %v260_v9 = vpop.permute.xlu0 %259 }
 0x2a7   :  { %v265_v13 = vadd.f32 %v260_v9, %v255_v59 }
 0x2aa   :  { %v262_v10 = vpop.permute.xlu1 %261  ;;  %v240_v12 = vpop.permute.xlu0 %239 }
 0x2ab   :  { %v266_v15 = vadd.f32 %v262_v10, %v256_v3  ;;  %v4079_v16 = vadd.f32 %v240_v12, %v235_v2 }
 0x2ad   :  { %3201 = vmatprep.mubr.msk.f32.mxu0 %vm279_vm3, %v4079_v16  ;;  %v4083_v18 = vpack.i.bf16 %v266_v15, %v265_v13 }
 0x2ae   :  { %v242_v19 = vpop.permute.xlu1 %241 }
 0x2af   :  { %3690 = vrot.lane.b32.xlu1 %v4083_v18, %s3864_s12  ;;  %3685 = vrot.lane.b32.xlu0 %v4083_v18, %s3862_s29  ;;  %v4093_v21 = vadd.f32 %v242_v19, %v236_v8 }
 0x2b3   :  { %3695 = vrot.lane.b32.xlu1 %v4083_v18, %s3865_s13  ;;  %469 = vrot.lane.b32.xlu0 %v4079_v16, %s3866_s14 }
 0x2b7   :  { %671 = vrot.lane.b32.xlu1 %v4079_v16, %s3867_s15  ;;  %471 = vrot.lane.b32.xlu0 %v4093_v21, %s3866_s14 }
 0x2bb   :  { %673 = vrot.lane.b32.xlu0 %v4093_v21, %s3867_s15 }
 0x321   :  { %v3691_v22 = vpop.permute.xlu1 %3690  ;;  %v3686_v24 = vpop.permute.xlu0 %3685 }
 0x322   :  { %v3693_v25 = vunpack.i.h.bf16 %v3691_v22  ;;  %v3692_v27 = vunpack.i.l.bf16 %v3691_v22  ;;  %v3688_v28 = vunpack.i.h.bf16 %v3686_v24  ;;  %v3687_v29 = vunpack.i.l.bf16 %v3686_v24 }
 0x324   :  { %v3466_v31 = vpack.c.bf16 %v3688_v28, %v3687_v29  ;;  %v3476_v32 = vpack.c.bf16 %v3693_v25, %v3692_v27 }
 0x325   :  { %v3696_v33 = vpop.permute.xlu1 %3695  ;;  %v470_v37 = vpop.permute.xlu0 %469 }
 0x326   :  { %3468 = vmatprep.subr.msk.bf16.mxu0 %vm4103_vm4, %v3466_v31  ;;  %v3698_v34 = vunpack.i.h.bf16 %v3696_v33  ;;  %v3697_v35 = vunpack.i.l.bf16 %v3696_v33 }
 0x327   :  { %3471 = vmatpush3.bf16.xpose.msk.msra.mxu0 %vm4103_vm4, %v3466_v31 }
 0x328   :  { %3478 = vmatprep.subr.msk.bf16.mxu0 %vm4103_vm4, %v3476_v32  ;;  %v3486_v36 = vpack.c.bf16 %v3698_v34, %v3697_v35 }
 0x329   :  { %v472_v38 = vpop.permute.xlu0 %471  ;;  %v672_v39 = vpop.permute.xlu1 %671 }
 0x32d   :  { %v674_v40 = vpop.permute.xlu0 %673 }
 0x32e   :  { %3202 = vmatmul.mubr.msk.f32.vlgmr.msra.gmra.mrb[6].mxu0 %vm279_vm3, %v4093_v21 }
 0x32f   :  { %3481 = vmatpush3.bf16.xpose.msk.msra.mxu0 %vm4103_vm4, %v3476_v32  ;;  %3215 = vmatprep.mubr.msk.f32.mxu0 %vm279_vm3, %v470_v37 }
 0x330   :  { %3488 = vmatprep.subr.msk.bf16.mxu0 %vm4103_vm4, %v3486_v36 }
 0x336   :  { %3216 = vmatmul.mubr.msk.f32.vlgmr.msra.gmra.mrb[8].mxu0 %vm279_vm3, %v472_v38 }
 0x337   :  { %3491 = vmatpush3.bf16.xpose.msk.msra.mxu0 %vm4103_vm4, %v3486_v36  ;;  %3229 = vmatprep.mubr.msk.f32.mxu0 %vm279_vm3, %v672_v39 }
 0x33e   :  { %3230 = vmatmul.mubr.msk.f32.vlgmr.msra.gmra.mrb[10].mxu0 %vm279_vm3, %v674_v40 }
 0x401   :  { %v3203_v41 = vpop.f32.mrb[6].mxu0 }
 0x402   :  { %v362_v42 = vadd.f32 %v3203_v41, %v4066_v61  ;;  %v356_v43 = vpop.f32.mrb[7].mxu0 }
 0x403   :  { %v357_v50 = vadd.f32 %v356_v43, %v4060_v54 }
 0x404   :  { %v369_v52 = vsel %vm365_vm5, %v362_v42, -inf }
 0x405   :  { %370 = vmax.xlane.f32.xlu0 %v369_v52  ;;  %v366_v53 = vsel %vm365_vm5, %v357_v50, -inf }
 0x406   :  { %367 = vmax.xlane.f32.xlu1 %v366_v53 }
 0x409   :  { %v3217_v55 = vpop.f32.mrb[8].mxu0 }
 0x40a   :  { %v557_v56 = vadd.f32 %v3217_v55, %v4066_v61  ;;  %v551_v57 = vpop.f32.mrb[9].mxu0 }
 0x40b   :  { %v552_v59 = vadd.f32 %v551_v57, %v4060_v54 }
 0x40c   :  { %v563_v60 = vsel %vm365_vm5, %v557_v56, -inf }
 0x40d   :  { %564 = vmax.xlane.f32.xlu1 %v563_v60  ;;  %v560_v62 = vsel %vm365_vm5, %v552_v59, -inf }
 0x40e   :  { %561 = vmax.xlane.f32.xlu0 %v560_v62 }
 0x411   :  { %v3231_v63 = vpop.f32.mrb[10].mxu0 }
 0x412   :  { %v759_v0 = vadd.f32 %v3231_v63, %v4066_v61  ;;  %v753_v1 = vpop.f32.mrb[11].mxu0 }
 0x413   :  { %v754_v2 = vadd.f32 %v753_v1, %v4060_v54 }
 0x414   :  { %v765_v3 = vsel %vm365_vm5, %v759_v0, -inf }
 0x415   :  { %766 = vmax.xlane.f32.xlu1 %v765_v3  ;;  %v762_v4 = vsel %vm365_vm5, %v754_v2, -inf }
 0x416   :  { %763 = vmax.xlane.f32.xlu0 %v762_v4 }
 0x492   :  { %v371_v8 = vpop.xlane.xlu0 %370 }
 0x493   :  { %v373_v9 = vsub.f32 %v362_v42, %v371_v8  ;;  %v368_v10 = vpop.xlane.xlu1 %367 }
 0x494   :  { %v372_v12 = vsub.f32 %v357_v50, %v368_v10 }
 0x495   :  { %v376_v13 = vmul.f32 1.442695, %v373_v9 }
 0x496   :  { %v374_v15 = vmul.f32 1.442695, %v372_v12 }
 0x497   :  { %3754 = vpow2.f32 %v376_v13 }
 0x498   :  { %3756 = vpow2.f32 %v374_v15 }
 0x49a   :  { %v565_v19 = vpop.xlane.xlu1 %564 }
 0x49b   :  { %v567_v22 = vsub.f32 %v557_v56, %v565_v19  ;;  %v562_v24 = vpop.xlane.xlu0 %561 }
 0x49c   :  { %v566_v25 = vsub.f32 %v552_v59, %v562_v24 }
 0x49d   :  { %v570_v27 = vmul.f32 1.442695, %v567_v22 }
 0x49e   :  { %v568_v28 = vmul.f32 1.442695, %v566_v25 }
 0x49f   :  { %3758 = vpow2.f32 %v570_v27 }
 0x4a0   :  { %3760 = vpow2.f32 %v568_v28 }
 0x4a1   :  { %v3755_v29 = vpop.eup %3754 }
 0x4a2   :  { %v3757_v31 = vpop.eup %3756  ;;  %v767_v32 = vpop.xlane.xlu1 %766  ;;  %v381_v33 = vsel %vm365_vm5, %v3755_v29, 0.0 }
 0x4a3   :  { %v769_v34 = vsub.f32 %v759_v0, %v767_v32  ;;  %v764_v35 = vpop.xlane.xlu0 %763  ;;  %382 = vadd.xlane.f32.xlu1 %v381_v33  ;;  %v378_v36 = vsel %vm365_vm5, %v3757_v31, 0.0 }
 0x4a4   :  { %v768_v37 = vsub.f32 %v754_v2, %v764_v35  ;;  %379 = vadd.xlane.f32.xlu0 %v378_v36 }
 0x4a5   :  { %v772_v38 = vmul.f32 1.442695, %v769_v34 }
 0x4a6   :  { %v770_v39 = vmul.f32 1.442695, %v768_v37 }
 0x4a7   :  { %3762 = vpow2.f32 %v772_v38 }
 0x4a8   :  { %3764 = vpow2.f32 %v770_v39 }
 0x4a9   :  { %v3759_v40 = vpop.eup %3758 }
 0x4aa   :  { %v3761_v41 = vpop.eup %3760  ;;  %v575_v42 = vsel %vm365_vm5, %v3759_v40, 0.0 }
 0x4ab   :  { %576 = vadd.xlane.f32.xlu1 %v575_v42  ;;  %v572_v43 = vsel %vm365_vm5, %v3761_v41, 0.0 }
 0x4ac   :  { %573 = vadd.xlane.f32.xlu0 %v572_v43 }
 0x4b1   :  { %v3763_v50 = vpop.eup %3762 }
 0x4b2   :  { %v3765_v52 = vpop.eup %3764  ;;  %v777_v53 = vsel %vm365_vm5, %v3763_v50, 0.0 }
 0x4b3   :  { %778 = vadd.xlane.f32.xlu1 %v777_v53  ;;  %v774_v55 = vsel %vm365_vm5, %v3765_v52, 0.0 }
 0x4b4   :  { %775 = vadd.xlane.f32.xlu0 %v774_v55 }
 0x4c4   :  { %3705 = vrot.lane.b32.xlu1 %v4073_v5, %s3867_s15 }
 0x4c8   :  { %3710 = vrot.lane.b32.xlu1 %v4083_v18, %s3868_s16 }
 0x4ca   :  { %3700 = vrot.lane.b32.xlu0 %v4073_v5, %s3866_s14 }
 0x4cc   :  { %873 = vrot.lane.b32.xlu1 %v4093_v21, %s3869_s2 }
 0x4ce   :  { %871 = vrot.lane.b32.xlu0 %v4079_v16, %s3869_s2 }
 0x530   :  { %v383_v56 = vpop.xlane.xlu1 %382 }
 0x531   :  { %3766 = vrcp.f32 %v383_v56  ;;  %v380_v57 = vpop.xlane.xlu0 %379 }
 0x532   :  { %3768 = vrcp.f32 %v380_v57 }
 0x538   :  { %v577_v63 = vpop.xlane.xlu1 %576 }
 0x539   :  { %v574_v59 = vpop.xlane.xlu0 %573 }
 0x53a   :  { %3770 = vrcp.f32 %v574_v59 }
 0x53b   :  { %v3767_v60 = vpop.eup %3766  ;;  %3772 = vrcp.f32 %v577_v63 }
 0x53c   :  { %v3769_v62 = vpop.eup %3768  ;;  %v387_v0 = vmul.f32 %v3767_v60, %v3755_v29 }
 0x53d   :  { %v386_v18 = vmul.f32 %v3769_v62, %v3757_v31 }
 0x53f   :  { %3208 = vmatprep.mubr.msk.f32.mxu1 %vm365_vm5, %v386_v18 }
 0x540   :  { %3209 = vmatmul.mubr.msk.f32.vlgmr.msra.gmra.mrb[0].mxu1 %vm365_vm5, %v387_v0  ;;  %v779_v21 = vpop.xlane.xlu1 %778 }
 0x541   :  { %v776_v1 = vpop.xlane.xlu0 %775 }
 0x542   :  { %3774 = vrcp.f32 %v776_v1 }
 0x543   :  { %3776 = vrcp.f32 %v779_v21 }
 0x544   :  { %v3771_v16 = vpop.eup %3770  ;;  %v3706_v2 = vpop.permute.xlu1 %3705 }
 0x545   :  { %v3701_v3 = vpop.permute.xlu0 %3700  ;;  %v580_v4 = vmul.f32 %v3771_v16, %v3761_v41  ;;  %v3708_v8 = vunpack.i.h.bf16 %v3706_v2  ;;  %v3707_v9 = vunpack.i.l.bf16 %v3706_v2  ;;  %v3773_v19 = vpop.eup %3772 }
 0x546   :  { %v3703_v10 = vunpack.i.h.bf16 %v3701_v3  ;;  %v3702_v12 = vunpack.i.l.bf16 %v3701_v3  ;;  %v581_v28 = vmul.f32 %v3773_v19, %v3759_v40  ;;  %v1103_v19 = vld [vmem:[%s4601_s4 + $0x8] sm:$0xff] }
 0x547   :  { %3222 = vmatprep.mubr.msk.f32.mxu1 %vm365_vm5, %v580_v4  ;;  %v3492_v22 = vpack.c.bf16 %v3708_v8, %v3707_v9 }
 0x548   :  { %v3482_v13 = vpack.c.bf16 %v3703_v10, %v3702_v12  ;;  %v3711_v15 = vpop.permute.xlu1 %3710 }
 0x549   :  { %v3713_v24 = vunpack.i.h.bf16 %v3711_v15  ;;  %v3712_v25 = vunpack.i.l.bf16 %v3711_v15  ;;  %v872_v34 = vpop.permute.xlu0 %871  ;;  %v1102_v15 = vld [vmem:[%s4601_s4] sm:$0xff] }
 0x54a   :  { %3483 = vmatprep.subr.bf16.mxu1 %v3482_v13 }
 0x54b   :  { %3485 = vmatpush3.bf16.msra.mxu1 %v3482_v13  ;;  %v3496_v32 = vpack.c.bf16 %v3713_v24, %v3712_v25  ;;  %v3506_v24 = vpack.c.bf16 %v1103_v19, %v1102_v15  ;;  %v1105_v25 = vld [vmem:[%s4601_s4 + $0x18] sm:$0xff]  ;;  %v1323_v15 = vld [vmem:[%s4603_s6] sm:$0xff]  ;;  %v1324_v19 = vld [vmem:[%s4603_s6 + $0x8] sm:$0xff] }
 0x54c   :  { %v3775_v27 = vpop.eup %3774  ;;  %3493 = vmatprep.subr.bf16.mxu1 %v3492_v22  ;;  %v874_v35 = vpop.permute.xlu1 %873 }
 0x54d   :  { %v3777_v29 = vpop.eup %3776  ;;  %v782_v31 = vmul.f32 %v3775_v27, %v3765_v52 }
 0x54e   :  { %3223 = vmatmul.mubr.msk.f32.vlgmr.msra.gmra.mrb[2].mxu1 %vm365_vm5, %v581_v28  ;;  %v783_v33 = vmul.f32 %v3777_v29, %v3763_v50 }
 0x54f   :  { %3495 = vmatpush3.bf16.msra.mxu1 %v3492_v22  ;;  %3236 = vmatprep.mubr.msk.f32.mxu1 %vm365_vm5, %v782_v31  ;;  %v1104_v22 = vld [vmem:[%s4601_s4 + $0x10] sm:$0xff] }
 0x550   :  { %3498 = vmatprep.subr.msk.bf16.mxu1 %vm4103_vm4, %v3496_v32  ;;  %v3510_v27 = vpack.c.bf16 %v1105_v25, %v1104_v22  ;;  %v3522_v22 = vpack.c.bf16 %v1324_v19, %v1323_v15 }
 0x552   :  { %3237 = vmatmul.mubr.msk.f32.vlgmr.msra.gmra.mrb[4].mxu1 %vm365_vm5, %v783_v33 }
 0x553   :  { %3243 = vmatprep.mubr.msk.f32.mxu1 %vm279_vm3, %v872_v34 }
 0x558   :  { %3501 = vmatpush3.bf16.xpose.msk.msra.mxu1 %vm4103_vm4, %v3496_v32 }
 0x55f   :  { %3244 = vmatmul.mubr.msk.f32.vlgmr.msra.gmra.mrb[6].mxu1 %vm279_vm3, %v874_v35 }
 0x613   :  { %v4165_v36 = vpop.f32.mrb[0].mxu1 }
 0x614   :  { %v4167_v37 = vpop.f32.mrb[1].mxu1 }
 0x621   :  { %v3224_v38 = vpop.f32.mrb[2].mxu1 }
 0x622   :  { %v662_v39 = vpop.f32.mrb[3].mxu1 }
 0x625   :  { %v3238_v40 = vpop.f32.mrb[4].mxu1 }
 0x626   :  { %v862_v41 = vpop.f32.mrb[5].mxu1 }
 0x632   :  { %v3245_v42 = vpop.f32.mrb[6].mxu1 }
 0x633   :  { %v959_v43 = vadd.f32 %v3245_v42, %v4066_v61  ;;  %v953_v50 = vpop.f32.mrb[7].mxu1 }
 0x634   :  { %v954_v52 = vadd.f32 %v953_v50, %v4060_v54 }
 0x635   :  { %v965_v53 = vsel %vm365_vm5, %v959_v43, -inf }
 0x636   :  { %966 = vmax.xlane.f32.xlu1 %v965_v53  ;;  %v962_v55 = vsel %vm365_vm5, %v954_v52, -inf }
 0x637   :  { %963 = vmax.xlane.f32.xlu0 %v962_v55 }
 0x647   :  { %3715 = vrot.lane.b32.xlu1 %v4073_v5, %s3869_s2 }
 0x64b   :  { %1075 = vrot.lane.b32.xlu1 %v3224_v38, %s3870_s17 }
 0x64f   :  { %1081 = vrot.lane.b32.xlu1 %v862_v41, %s3871_s0 }
 0x6c3   :  { %v967_v56 = vpop.xlane.xlu1 %966 }
 0x6c4   :  { %v969_v57 = vsub.f32 %v959_v43, %v967_v56  ;;  %v964_v59 = vpop.xlane.xlu0 %963 }
 0x6c5   :  { %v968_v60 = vsub.f32 %v954_v52, %v964_v59 }
 0x6c6   :  { %v972_v62 = vmul.f32 1.442695, %v969_v57 }
 0x6c7   :  { %v970_v63 = vmul.f32 1.442695, %v968_v60  ;;  %v3716_v18 = vpop.permute.xlu1 %3715 }
 0x6c8   :  { %v3718_v0 = vunpack.i.h.bf16 %v3716_v18  ;;  %v3717_v21 = vunpack.i.l.bf16 %v3716_v18 }
 0x6c9   :  { %3778 = vpow2.f32 %v970_v63 }
 0x6ca   :  { %v3502_v1 = vpack.c.bf16 %v3718_v0, %v3717_v21  ;;  %3780 = vpow2.f32 %v972_v62  ;;  %v1222_v62 = vsub.s32 3, %v4050_v49 }
 0x6cb   :  { %v1076_v32 = vpop.permute.xlu1 %1075 }
 0x6cc   :  { %3503 = vmatprep.subr.bf16.mxu0 %v3502_v1  ;;  %v4215_v63 = vrot.slane %v4056_v51, %v1222_v62 }
 0x6cd   :  { %3505 = vmatpush3.bf16.msra.mxu0 %v3502_v1 }
 0x6ce   :  { %3507 = vmatprep.subr.bf16.mxu0 %v3506_v24 }
 0x6cf   :  { %v1082_v34 = vpop.permute.xlu1 %1081 }
 0x6d3   :  { %v3779_v5 = vpop.eup %3778 }
 0x6d4   :  { %v974_v16 = vsel %vm365_vm5, %v3779_v5, 0.0  ;;  %v3781_v2 = vpop.eup %3780 }
 0x6d5   :  { %975 = vadd.xlane.f32.xlu0 %v974_v16  ;;  %v977_v3 = vsel %vm365_vm5, %v3781_v2, 0.0 }
 0x6d9   :  { %978 = vadd.xlane.f32.xlu0 %v977_v3 }
 0x6ef   :  { %1073 = vrot.lane.b32.xlu0 %v662_v39, %s3870_s17  ;;  %v1096_v39 = vsel %vm279_vm3, %v4165_v36, %v1076_v32 }
 0x6f3   :  { %1083 = vrot.lane.b32.xlu0 %v3238_v40, %s3871_s0 }
 0x762   :  { %v976_v4 = vpop.xlane.xlu0 %975 }
 0x763   :  { %3782 = vrcp.f32 %v976_v4  ;;  %v1232_v4 = vld [vmem:[%s4602_s5] sm:$0xff] }
 0x766   :  { %v979_v8 = vpop.xlane.xlu0 %978 }
 0x767   :  { %3784 = vrcp.f32 %v979_v8  ;;  %v1233_v8 = vld [vmem:[%s4602_s5 + $0x8] sm:$0xff] }
 0x76a   :  { %v1074_v31 = vpop.permute.xlu0 %1073 }
 0x76b   :  { %v1095_v35 = vsel %vm279_vm3, %v4167_v37, %v1074_v31 }
 0x76c   :  { %v1097_v41 = vsel %vm365_vm5, %v1095_v35, %v1082_v34 }
 0x76d   :  { %v3783_v9 = vpop.eup %3782 }
 0x76e   :  { %v982_v10 = vmul.f32 %v3783_v9, %v3779_v5  ;;  %v1084_v33 = vpop.permute.xlu0 %1083  ;;  %v3514_v9 = vpack.c.bf16 %v1233_v8, %v1232_v4 }
 0x76f   :  { %v1098_v42 = vsel %vm365_vm5, %v1096_v39, %v1084_v33 }
 0x770   :  { %3250 = vmatprep.mubr.msk.f32.mxu0 %vm365_vm5, %v982_v10  ;;  %3515 = vmatprep.subr.bf16.mxu1 %v3514_v9  ;;  %v1234_v10 = vld [vmem:[%s4602_s5 + $0x10] sm:$0xff] }
 0x771   :  { %v3785_v12 = vpop.eup %3784  ;;  %3517 = vmatpush3.bf16.msra.mxu1 %v3514_v9 }
 0x772   :  { %v983_v13 = vmul.f32 %v3785_v12, %v3781_v2  ;;  %v1235_v12 = vld [vmem:[%s4602_s5 + $0x18] sm:$0xff] }
 0x774   :  { %3251 = vmatmul.mubr.msk.f32.vlgmr.msra.gmra.mrb[12].mxu0 %vm365_vm5, %v983_v13  ;;  %v3518_v13 = vpack.c.bf16 %v1235_v12, %v1234_v10 }
 0x775   :  { %3509 = vmatpush3.bf16.msra.mxu0 %v3506_v24  ;;  %v1326_v24 = vld [vmem:[%s4603_s6 + $0x18] sm:$0xff] }
 0x776   :  { %3511 = vmatprep.subr.bf16.mxu0 %v3510_v27  ;;  %3519 = vmatprep.subr.bf16.mxu1 %v3518_v13 }
 0x777   :  { %3521 = vmatpush3.bf16.msra.mxu1 %v3518_v13 }
 0x779   :  { %3513 = vmatpush3.bf16.msra.mxu0 %v3510_v27  ;;  %v1327_v27 = vld [vmem:[%s4603_s6 + $0x20] sm:$0xff] }
 0x77a   :  { %3523 = vmatprep.subr.bf16.mxu0 %v3522_v22 }
 0x847   :  { %v3252_v28 = vpop.f32.mrb[12].mxu0 }
 0x848   :  { %1091 = vrot.lane.b32.xlu0 %v3252_v28, %s3872_s26  ;;  %v1062_v29 = vpop.f32.mrb[13].mxu0  ;;  %v1328_v28 = vld [vmem:[%s4603_s6 + $0x28] sm:$0xff] }
 0x849   :  { %1089 = vrot.lane.b32.xlu1 %v1062_v29, %s3872_s26  ;;  %v3530_v29 = vpack.c.bf16 %v1328_v28, %v1327_v27  ;;  %v2945_v28 = vld [vmem:[%s4600_s3 + $0x48] sm:$0xff] }
 0x84d   :  { %1107 = vrot.lane.b32.xlu1 %v4063_v58, %s3863_s11 }
 0x8ba   :  { %v1092_v38 = vpop.permute.xlu0 %1091 }
 0x8bb   :  { %v1090_v40 = vpop.permute.xlu1 %1089  ;;  %v1101_v50 = vsel %vm1099_vm6, %v1098_v42, %v1092_v38 }
 0x8bc   :  { %v1100_v43 = vsel %vm1099_vm6, %v1097_v41, %v1090_v40 }
 0x8bd   :  { %3261 = vmatprep.mubr.msk.f32.mxu0 %vm145_vm2, %v1100_v43 }
 0x8be   :  { %3262 = vmatmul.mubr.msk.f32.vlgmr.msra.gmra.mrb[14].mxu0 %vm145_vm2, %v1101_v50 }
 0x8bf   :  { %v1108_v52 = vpop.permute.xlu1 %1107  ;;  %3525 = vmatpush3.bf16.msra.mxu0 %v3522_v22 }
 0x991   :  { %v3263_v37 = vpop.f32.mrb[14].mxu0 }
 0x992   :  { %v1188_v53 = vadd.f32 %v3263_v37, %v1108_v52  ;;  %v1182_v55 = vpop.f32.mrb[15].mxu0 }
 0x993   :  { %v1183_v56 = vadd.f32 %v1182_v55, %v1108_v52  ;;  %v1329_v55 = vld [vmem:[%s4603_s6 + $0x30] sm:$0xff] }
 0x994   :  { %v1192_v36 = vadd.f32 %v4041_v47, %v1188_v53 }
 0x995   :  { %v1191_v57 = vadd.f32 %v1183_v56, %v4043_v48  ;;  %v1330_v56 = vld [vmem:[%s4603_s6 + $0x38] sm:$0xff] }
 0x996   :  { %v1196_v59 = vsel %vm145_vm2, %v1192_v36, 0.0 }
 0x997   :  { %1197 = vadd.xlane.f32.xlu1 %v1196_v59  ;;  %v1193_v60 = vsel %vm145_vm2, %v1191_v57, 0.0 }
 0x998   :  { %1194 = vadd.xlane.f32.xlu0 %v1193_v60 }
 0x9a8   :  { %1227 = vrot.lane.b32.xlu1 %v4215_v63, %s3863_s11 }
 0xa24   :  { %v1198_v18 = vpop.xlane.xlu1 %1197 }
 0xa25   :  { %v1201_v0 = vmul.f32 0.03125, %v1198_v18  ;;  %v1195_v21 = vpop.xlane.xlu0 %1194 }
 0xa26   :  { %v1200_v47 = vmul.f32 0.03125, %v1195_v21 }
 0xa27   :  { %v1203_v1 = vsub.f32 %v1192_v36, %v1201_v0  ;;  %v3534_v36 = vpack.c.bf16 %v1330_v56, %v1329_v55 }
 0xa28   :  { %v1202_v48 = vsub.f32 %v1191_v57, %v1200_v47  ;;  %v1228_v41 = vpop.permute.xlu1 %1227  ;;  %v1238_v57 = vsub.s32 2, %v4050_v49 }
 0xa29   :  { %v1205_v2 = vmul.f32 %v1203_v1, %v1203_v1 }
 0xa2a   :  { %v1204_v5 = vmul.f32 %v1202_v48, %v1202_v48  ;;  %v1239_v59 = vrot.slane %v4056_v51, %v1238_v57 }
 0xa2b   :  { %v1209_v3 = vsel %vm145_vm2, %v1205_v2, 0.0 }
 0xa2c   :  { %v1206_v16 = vsel %vm145_vm2, %v1204_v5, 0.0 }
 0xa2d   :  { %1207 = vadd.xlane.f32.xlu0 %v1206_v16 }
 0xa31   :  { %1210 = vadd.xlane.f32.xlu0 %v1209_v3 }
 0xa47   :  { %1331 = vrot.lane.b32.xlu0 %v4063_v58, %s3862_s29  ;;  %v1325_v58 = vld [vmem:[%s4603_s6 + $0x10] sm:$0xff] }
 0xa48   :  { %v3526_v25 = vpack.c.bf16 %v1326_v24, %v1325_v58 }
 0xa4a   :  { %3527 = vmatprep.subr.bf16.mxu0 %v3526_v25 }
 0xa4b   :  { %3529 = vmatpush3.bf16.msra.mxu0 %v3526_v25 }
 0xa4c   :  { %3531 = vmatprep.subr.bf16.mxu0 %v3530_v29 }
 0xa4f   :  { %3533 = vmatpush3.bf16.msra.mxu0 %v3530_v29  ;;  %v2947_v29 = vld [vmem:[%s4600_s3 + $0x58] sm:$0xff] }
 0xa50   :  { %3535 = vmatprep.subr.bf16.mxu0 %v3534_v36 }
 0xa53   :  { %3537 = vmatpush3.bf16.msra.mxu0 %v3534_v36 }
 0xaba   :  { %v1208_v31 = vpop.xlane.xlu0 %1207 }
 0xabb   :  { %v1212_v32 = vmul.f32 0.03125, %v1208_v31  ;;  %v2944_v31 = vld [vmem:[%s4600_s3 + $0x40] sm:$0xff] }
 0xabd   :  { %v1214_v33 = vadd.f32 1e-05, %v1212_v32  ;;  %v3538_v32 = vpack.c.bf16 %v2947_v29, %v2945_v28 }
 0xabe   :  { %v1211_v34 = vpop.xlane.xlu0 %1210 }
 0xabf   :  { %3786 = vrsqrt.f32 %v1214_v33  ;;  %v1213_v35 = vmul.f32 0.03125, %v1211_v34  ;;  %v2946_v33 = vld [vmem:[%s4600_s3 + $0x50] sm:$0xff]  ;;  %3539 = vmatprep.subr.bf16.mxu1 %v3538_v32 }
 0xac0   :  { %v3540_v34 = vpack.c.bf16 %v2946_v33, %v2944_v31 }
 0xac1   :  { %v1215_v38 = vadd.f32 1e-05, %v1213_v35  ;;  %v2949_v35 = vld [vmem:[%s4600_s3 + $0x68] sm:$0xff] }
 0xac3   :  { %3788 = vrsqrt.f32 %v1215_v38  ;;  %v2951_v38 = vld [vmem:[%s4600_s3 + $0x78] sm:$0xff] }
 0xac9   :  { %v3787_v39 = vpop.eup %3786 }
 0xaca   :  { %v1218_v40 = vmul.f32 %v3787_v39, %v1202_v48  ;;  %v3542_v39 = vpack.c.bf16 %v2951_v38, %v2949_v35 }
 0xacc   :  { %v1224_v42 = vmul.f32 %v4215_v63, %v1218_v40  ;;  %v2948_v40 = vld [vmem:[%s4600_s3 + $0x60] sm:$0xff] }
 0xacd   :  { %v3789_v43 = vpop.eup %3788 }
 0xace   :  { %v1219_v50 = vmul.f32 %v3789_v43, %v1203_v1  ;;  %v1230_v52 = vadd.f32 %v1228_v41, %v1224_v42  ;;  %v1332_v1 = vpop.permute.xlu0 %1331 }
 0xad0   :  { %v1225_v37 = vmul.f32 %v4215_v63, %v1219_v50  ;;  %3272 = vmatprep.mubr.msk.f32.mxu1 %vm145_vm2, %v1230_v52 }
 0xad2   :  { %v1231_v53 = vadd.f32 %v1228_v41, %v1225_v37  ;;  %v2950_v41 = vld [vmem:[%s4600_s3 + $0x70] sm:$0xff] }
 0xad4   :  { %3273 = vmatmul.mubr.msk.f32.vlgmr.msra.gmra.mrb[8].mxu1 %vm145_vm2, %v1231_v53 }
 0xad5   :  { %1533 = vmatprep.mubr.f32.mxu1 %v3861_v44  ;;  %3541 = vmatpush1.bf16.msra.mxu1 %v3540_v34 }
 0xad6   :  { %3543 = vmatprep.subr.bf16.mxu1 %v3542_v39 }
 0xba7   :  { %v3274_v60 = vpop.f32.mrb[8].mxu1 }
 0xba8   :  { %v1318_v62 = vadd.f32 %v3274_v60, %v1239_v59  ;;  %v1312_v18 = vpop.f32.mrb[9].mxu1 }
 0xba9   :  { %v1313_v0 = vadd.f32 %v1312_v18, %v1239_v59 }
 0xbaa   :  { %v1322_v47 = vmax.f32 %v1318_v62, 0.0 }
 0xbab   :  { %v1321_v21 = vmax.f32 %v1313_v0, 0.0 }
 0xbad   :  { %3291 = vmatprep.mubr.msk.f32.mxu0 %vm1334_vm7, %v1321_v21 }
 0xbae   :  { %3292 = vmatmul.mubr.msk.f32.vlgmr.msra.gmra.mrb[16].mxu0 %vm1334_vm7, %v1322_v47  ;;  %v1548_v47 = vsub.s32 4, %v4050_v49 }
 0xc81   :  { %v3293_v48 = vpop.f32.mrb[16].mxu0 }
 0xc82   :  { %v1413_v5 = vadd.f32 %v3293_v48, %v1332_v1  ;;  %v1407_v16 = vpop.f32.mrb[17].mxu0  ;;  %v1578_v48 = vsub.s32 5, %v4050_v49 }
 0xc83   :  { %v1408_v2 = vadd.f32 %v1407_v16, %v1332_v1  ;;  %v1549_v1 = vrot.slane %v4056_v51, %v1548_v47 }
 0xc84   :  { %v1417_v3 = vadd.f32 %v1413_v5, %v1231_v53 }
 0xc85   :  { %v1416_v4 = vadd.f32 %v1408_v2, %v1230_v52 }
 0xc86   :  { %v1421_v8 = vsel %vm145_vm2, %v1417_v3, 0.0 }
 0xc87   :  { %1422 = vadd.xlane.f32.xlu0 %v1421_v8  ;;  %v1418_v9 = vsel %vm145_vm2, %v1416_v4, 0.0 }
 0xc88   :  { %1419 = vadd.xlane.f32.xlu1 %v1418_v9 }
 0xd14   :  { %v1423_v10 = vpop.xlane.xlu0 %1422 }
 0xd15   :  { %v1425_v12 = vmul.f32 0.03125, %v1423_v10  ;;  %v1420_v13 = vpop.xlane.xlu1 %1419 }
 0xd16   :  { %v1424_v15 = vmul.f32 0.03125, %v1420_v13 }
 0xd17   :  { %v1427_v19 = vsub.f32 %v1417_v3, %v1425_v12  ;;  %v4313_v3 = vrot.slane %v4056_v51, %v1578_v48 }
 0xd18   :  { %v1426_v58 = vsub.f32 %v1416_v4, %v1424_v15 }
 0xd19   :  { %v1429_v22 = vmul.f32 %v1427_v19, %v1427_v19 }
 0xd1a   :  { %v1428_v24 = vmul.f32 %v1426_v58, %v1426_v58 }
 0xd1b   :  { %v1433_v25 = vsel %vm145_vm2, %v1429_v22, 0.0 }
 0xd1c   :  { %1434 = vadd.xlane.f32.xlu0 %v1433_v25  ;;  %v1430_v27 = vsel %vm145_vm2, %v1428_v24, 0.0 }
 0xd1d   :  { %1431 = vadd.xlane.f32.xlu1 %v1430_v27 }
 0xd2e   :  { %1444 = vrot.lane.b32.xlu1 %v4215_v63, %s3862_s29 }
 0xd32   :  { %1449 = vrot.lane.b32.xlu0 %v4215_v63, %s3873_s9  ;;  %v3544_v63 = vpack.c.bf16 %v2950_v41, %v2948_v40 }
 0xd34   :  { %3545 = vmatpush1.bf16.msra.mxu1 %v3544_v63 }
 0xda9   :  { %v1435_v42 = vpop.xlane.xlu0 %1434 }
 0xdaa   :  { %v1437_v43 = vmul.f32 0.03125, %v1435_v42  ;;  %v1432_v50 = vpop.xlane.xlu1 %1431 }
 0xdab   :  { %v1436_v52 = vmul.f32 0.03125, %v1432_v50 }
 0xdac   :  { %v1439_v37 = vadd.f32 1e-05, %v1437_v43 }
 0xdad   :  { %v1438_v53 = vadd.f32 1e-05, %v1436_v52  ;;  %v1450_v60 = vpop.permute.xlu0 %1449 }
 0xdae   :  { %3790 = vrsqrt.f32 %v1439_v37  ;;  %v1445_v36 = vpop.permute.xlu1 %1444 }
 0xdaf   :  { %3792 = vrsqrt.f32 %v1438_v53 }
 0xdb8   :  { %v3791_v55 = vpop.eup %3790 }
 0xdb9   :  { %v3793_v56 = vpop.eup %3792  ;;  %v1443_v59 = vmul.f32 %v3791_v55, %v1427_v19 }
 0xdba   :  { %v1442_v57 = vmul.f32 %v3793_v56, %v1426_v58 }
 0xdbb   :  { %v1448_v18 = vmul.f32 %v1445_v36, %v1443_v59 }
 0xdbc   :  { %v1447_v62 = vmul.f32 %v1445_v36, %v1442_v57 }
 0xdbd   :  { %v4305_v21 = vadd.f32 %v1450_v60, %v1448_v18 }
 0xdbe   :  { %v4300_v0 = vadd.f32 %v1450_v60, %v1447_v62 }
 0xdc0   :  { %2952 = vmatmul.mubr.msk.f32.vlgmr.msra.gmra.mrb[10].mxu1 %vm145_vm2, %v4300_v0 }
 0xdc1   :  { %1539 = vmatprep.mubr.f32.mxu1 %v3861_v44 }
 0xdc4   :  { %2953 = vmatmul.mubr.msk.f32.gmra.mrb[12].mxu1 %vm145_vm2, %v4305_v21 }
 0xe93   :  { %v1535_v5 = vpop.f32.mrb[10].mxu1 }
 0xe94   :  { %v1550_v16 = vadd.f32 %v1549_v1, %v1535_v5  ;;  %v1537_v2 = vpop.f32.mrb[11].mxu1 }
 0xe95   :  { %v1580_v12 = vadd.f32 %v4313_v3, %v1537_v2 }
 0xe96   :  { %v1552_v4 = vmul.f32 %v1550_v16, %v4030_v45  ;;  %v1564_v44 = vmul.f32 %v1550_v16, %v4060_v54 }
 0xe97   :  { %v1541_v8 = vpop.f32.mrb[12].mxu1 }
 0xe98   :  { %v1551_v9 = vadd.f32 %v1549_v1, %v1541_v8  ;;  %1568 = vrot.lane.b32.xlu1 %v1564_v44, %s3863_s11  ;;  %1556 = vrot.lane.b32.xlu0 %v1552_v4, %s3863_s11  ;;  %v1543_v10 = vpop.f32.mrb[13].mxu1 }
 0xe99   :  { %v1581_v13 = vadd.f32 %v4313_v3, %v1543_v10 }
 0xe9a   :  { %v1565_v15 = vmul.f32 %v1551_v9, %v4066_v61  ;;  %v1553_v45 = vmul.f32 %v1551_v9, %v4037_v46 }
 0xe9b   :  { %v3552_v19 = vpack.c.bf16 %v1581_v13, %v1580_v12  ;;  %v4322_v51 = vpack.i.bf16 %v1581_v13, %v1580_v12 }
 0xe9c   :  { %1570 = vrot.lane.b32.xlu1 %v1565_v15, %s3863_s11 }
 0xe9d   :  { %3553 = vmatprep.subr.bf16.mxu0 %v3552_v19 }
 0xe9e   :  { %3555 = vmatpush3.bf16.msra.mxu0 %v3552_v19 }
 0xea0   :  { %1558 = vrot.lane.b32.xlu1 %v1553_v45, %s3863_s11 }
 0xf0a   :  { %v1569_v58 = vpop.permute.xlu1 %1568  ;;  %v1557_v22 = vpop.permute.xlu0 %1556 }
 0xf0b   :  { %v4327_v24 = vadd.f32 %v1557_v22, %v1552_v4  ;;  %v1574_v27 = vadd.f32 %v1569_v58, %v1564_v44 }
 0xf0d   :  { %3298 = vmatprep.mubr.msk.f32.mxu1 %vm279_vm3, %v4327_v24 }
 0xf0e   :  { %v1571_v25 = vpop.permute.xlu1 %1570 }
 0xf0f   :  { %v1575_v28 = vadd.f32 %v1571_v25, %v1565_v15 }
 0xf11   :  { %v4331_v29 = vpack.i.bf16 %v1575_v28, %v1574_v27 }
 0xf12   :  { %v1559_v31 = vpop.permute.xlu1 %1558 }
 0xf13   :  { %3720 = vrot.lane.b32.xlu0 %v4331_v29, %s3862_s29  ;;  %3725 = vrot.lane.b32.xlu1 %v4331_v29, %s3864_s12  ;;  %v4337_v46 = vadd.f32 %v1559_v31, %v1553_v45 }
 0xf17   :  { %1776 = vrot.lane.b32.xlu0 %v4327_v24, %s3866_s14  ;;  %1778 = vrot.lane.b32.xlu1 %v4337_v46, %s3866_s14 }
 0xf85   :  { %v3721_v32 = vpop.permute.xlu0 %3720  ;;  %v3726_v33 = vpop.permute.xlu1 %3725 }
 0xf86   :  { %v3723_v34 = vunpack.i.h.bf16 %v3721_v32  ;;  %v3722_v35 = vunpack.i.l.bf16 %v3721_v32  ;;  %v3728_v38 = vunpack.i.h.bf16 %v3726_v33  ;;  %v3727_v39 = vunpack.i.l.bf16 %v3726_v33 }
 0xf88   :  { %v3546_v40 = vpack.c.bf16 %v3723_v34, %v3722_v35  ;;  %v3556_v41 = vpack.c.bf16 %v3728_v38, %v3727_v39 }
 0xf89   :  { %v1777_v63 = vpop.permute.xlu0 %1776  ;;  %v1779_v42 = vpop.permute.xlu1 %1778 }
 0xf8a   :  { %3548 = vmatprep.subr.msk.bf16.mxu1 %vm4103_vm4, %v3546_v40 }
 0xf8b   :  { %3551 = vmatpush3.bf16.xpose.msk.msra.mxu1 %vm4103_vm4, %v3546_v40 }
 0xf8c   :  { %3558 = vmatprep.subr.msk.bf16.mxu1 %vm4103_vm4, %v3556_v41 }
 0xf92   :  { %3299 = vmatmul.mubr.msk.f32.vlgmr.msra.gmra.mrb[14].mxu1 %vm279_vm3, %v4337_v46 }
 0xf93   :  { %3561 = vmatpush3.bf16.xpose.msk.msra.mxu1 %vm4103_vm4, %v3556_v41  ;;  %3312 = vmatprep.mubr.msk.f32.mxu1 %vm279_vm3, %v1777_v63 }
 0xf9a   :  { %3313 = vmatmul.mubr.msk.f32.vlgmr.msra.gmra.mrb[16].mxu1 %vm279_vm3, %v1779_v42 }
0x1065   :  { %v3300_v43 = vpop.f32.mrb[14].mxu1 }
0x1066   :  { %v1670_v50 = vadd.f32 %v3300_v43, %v4066_v61  ;;  %v1664_v52 = vpop.f32.mrb[15].mxu1 }
0x1067   :  { %v1665_v37 = vadd.f32 %v1664_v52, %v4060_v54 }
0x1068   :  { %v1676_v53 = vsel %vm365_vm5, %v1670_v50, -inf }
0x1069   :  { %1677 = vmax.xlane.f32.xlu1 %v1676_v53  ;;  %v1673_v55 = vsel %vm365_vm5, %v1665_v37, -inf }
0x106a   :  { %1674 = vmax.xlane.f32.xlu0 %v1673_v55 }
0x106d   :  { %v3314_v56 = vpop.f32.mrb[16].mxu1 }
0x106e   :  { %v1858_v36 = vpop.f32.mrb[17].mxu1  ;;  %v1864_v59 = vadd.f32 %v3314_v56, %v4066_v61 }
0x106f   :  { %v1859_v57 = vadd.f32 %v1858_v36, %v4060_v54 }
0x1070   :  { %v1870_v62 = vsel %vm365_vm5, %v1864_v59, -inf }
0x1071   :  { %v1867_v60 = vsel %vm365_vm5, %v1859_v57, -inf }
0x1072   :  { %1868 = vmax.xlane.f32.xlu0 %v1867_v60 }
0x1076   :  { %1871 = vmax.xlane.f32.xlu0 %v1870_v62 }
0x107a   :  { %3730 = vrot.lane.b32.xlu1 %v4322_v51, %s3866_s14 }
0x10f6   :  { %v1678_v18 = vpop.xlane.xlu1 %1677 }
0x10f7   :  { %v1680_v47 = vsub.f32 %v1670_v50, %v1678_v18  ;;  %v1675_v1 = vpop.xlane.xlu0 %1674 }
0x10f8   :  { %v1679_v48 = vsub.f32 %v1665_v37, %v1675_v1 }
0x10f9   :  { %v1683_v5 = vmul.f32 1.442695, %v1680_v47 }
0x10fa   :  { %v1681_v16 = vmul.f32 1.442695, %v1679_v48  ;;  %v3731_v2 = vpop.permute.xlu1 %3730 }
0x10fb   :  { %3794 = vpow2.f32 %v1683_v5  ;;  %v3733_v4 = vunpack.i.h.bf16 %v3731_v2  ;;  %v3732_v44 = vunpack.i.l.bf16 %v3731_v2 }
0x10fc   :  { %3796 = vpow2.f32 %v1681_v16 }
0x10fd   :  { %v3562_v8 = vpack.c.bf16 %v3733_v4, %v3732_v44 }
0x10ff   :  { %v1869_v9 = vpop.xlane.xlu0 %1868  ;;  %3563 = vmatprep.subr.bf16.mxu0 %v3562_v8 }
0x1100   :  { %v1873_v27 = vsub.f32 %v1859_v57, %v1869_v9 }
0x1102   :  { %v1875_v28 = vmul.f32 1.442695, %v1873_v27 }
0x1103   :  { %v1872_v10 = vpop.xlane.xlu0 %1871 }
0x1104   :  { %v1874_v12 = vsub.f32 %v1864_v59, %v1872_v10 }
0x1105   :  { %v3795_v13 = vpop.eup %3794 }
0x1106   :  { %v3797_v15 = vpop.eup %3796  ;;  %v1877_v19 = vmul.f32 1.442695, %v1874_v12  ;;  %v1688_v45 = vsel %vm365_vm5, %v3795_v13, 0.0 }
0x1107   :  { %1689 = vadd.xlane.f32.xlu0 %v1688_v45  ;;  %v1685_v58 = vsel %vm365_vm5, %v3797_v15, 0.0 }
0x1108   :  { %3798 = vpow2.f32 %v1877_v19  ;;  %1686 = vadd.xlane.f32.xlu1 %v1685_v58 }
0x1109   :  { %3800 = vpow2.f32 %v1875_v28 }
0x1112   :  { %v3799_v22 = vpop.eup %3798 }
0x1113   :  { %v1882_v25 = vsel %vm365_vm5, %v3799_v22, 0.0  ;;  %v3801_v31 = vpop.eup %3800 }
0x1114   :  { %1883 = vadd.xlane.f32.xlu0 %v1882_v25  ;;  %v1879_v32 = vsel %vm365_vm5, %v3801_v31, 0.0 }
0x1119   :  { %1978 = vrot.lane.b32.xlu1 %v4327_v24, %s3867_s15 }
0x112a   :  { %3735 = vrot.lane.b32.xlu0 %v4331_v29, %s3865_s13 }
0x113d   :  { %1880 = vadd.xlane.f32.xlu1 %v1879_v32 }
0x114e   :  { %1980 = vrot.lane.b32.xlu1 %v4337_v46, %s3867_s15 }
0x1194   :  { %v1690_v33 = vpop.xlane.xlu0 %1689 }
0x1195   :  { %3802 = vrcp.f32 %v1690_v33  ;;  %v1687_v34 = vpop.xlane.xlu1 %1686 }
0x1196   :  { %3804 = vrcp.f32 %v1687_v34 }
0x1199   :  { %v1979_v52 = vpop.permute.xlu1 %1978 }
0x119f   :  { %v3803_v35 = vpop.eup %3802 }
0x11a0   :  { %v3805_v38 = vpop.eup %3804  ;;  %v1694_v41 = vmul.f32 %v3803_v35, %v3795_v13 }
0x11a1   :  { %v1884_v39 = vpop.xlane.xlu0 %1883  ;;  %v1693_v40 = vmul.f32 %v3805_v38, %v3797_v15 }
0x11a2   :  { %3806 = vrcp.f32 %v1884_v39 }
0x11a3   :  { %3305 = vmatprep.mubr.msk.f32.mxu0 %vm365_vm5, %v1693_v40 }
0x11a4   :  { %3306 = vmatmul.mubr.msk.f32.vlgmr.msra.gmra.mrb[18].mxu0 %vm365_vm5, %v1694_v41 }
0x11a5   :  { %3565 = vmatpush3.bf16.msra.mxu0 %v3562_v8  ;;  %v3736_v63 = vpop.permute.xlu0 %3735 }
0x11a6   :  { %v3738_v42 = vunpack.i.h.bf16 %v3736_v63  ;;  %v3737_v43 = vunpack.i.l.bf16 %v3736_v63 }
0x11a8   :  { %v3566_v50 = vpack.c.bf16 %v3738_v42, %v3737_v43 }
0x11aa   :  { %3568 = vmatprep.subr.msk.bf16.mxu0 %vm4103_vm4, %v3566_v50 }
0x11ac   :  { %v3807_v53 = vpop.eup %3806 }
0x11ad   :  { %v1888_v36 = vmul.f32 %v3807_v53, %v3799_v22 }
0x11ca   :  { %v1881_v37 = vpop.xlane.xlu1 %1880 }
0x11cb   :  { %3808 = vrcp.f32 %v1881_v37 }
0x11ce   :  { %v1981_v57 = vpop.permute.xlu1 %1980 }
0x11d5   :  { %v3809_v55 = vpop.eup %3808 }
0x11d6   :  { %v1887_v56 = vmul.f32 %v3809_v55, %v3801_v31 }
0x11d8   :  { %3319 = vmatprep.mubr.msk.f32.mxu0 %vm365_vm5, %v1887_v56 }
0x11d9   :  { %3320 = vmatmul.mubr.msk.f32.vlgmr.msra.gmra.mrb[20].mxu0 %vm365_vm5, %v1888_v36 }
0x11da   :  { %3571 = vmatpush3.bf16.xpose.msk.msra.mxu0 %vm4103_vm4, %v3566_v50  ;;  %3326 = vmatprep.mubr.msk.f32.mxu0 %vm279_vm3, %v1979_v52 }
0x11e1   :  { %3327 = vmatmul.mubr.msk.f32.vlgmr.msra.gmra.mrb[22].mxu0 %vm279_vm3, %v1981_v57 }
0x1277   :  { %v4385_v59 = vpop.f32.mrb[18].mxu0 }
0x1278   :  { %v4387_v60 = vpop.f32.mrb[19].mxu0 }
0x12ac   :  { %v4389_v62 = vpop.f32.mrb[20].mxu0 }
0x12ad   :  { %v4391_v18 = vpop.f32.mrb[21].mxu0 }
0x12b4   :  { %v3328_v47 = vpop.f32.mrb[22].mxu0 }
0x12b5   :  { %v2066_v1 = vadd.f32 %v3328_v47, %v4066_v61  ;;  %v2060_v48 = vpop.f32.mrb[23].mxu0 }
0x12b6   :  { %v2061_v5 = vadd.f32 %v2060_v48, %v4060_v54 }
0x12b7   :  { %v2072_v16 = vsel %vm365_vm5, %v2066_v1, -inf }
0x12b8   :  { %2073 = vmax.xlane.f32.xlu1 %v2072_v16  ;;  %v2069_v2 = vsel %vm365_vm5, %v2061_v5, -inf }
0x12b9   :  { %2070 = vmax.xlane.f32.xlu0 %v2069_v2 }
0x12c9   :  { %3740 = vrot.lane.b32.xlu1 %v4322_v51, %s3867_s15 }
0x12cd   :  { %2178 = vrot.lane.b32.xlu1 %v4327_v24, %s3869_s2 }
0x12d1   :  { %2180 = vrot.lane.b32.xlu1 %v4337_v46, %s3869_s2 }
0x1345   :  { %v2074_v4 = vpop.xlane.xlu1 %2073 }
0x1346   :  { %v2076_v44 = vsub.f32 %v2066_v1, %v2074_v4  ;;  %v2071_v8 = vpop.xlane.xlu0 %2070 }
0x1347   :  { %v2075_v9 = vsub.f32 %v2061_v5, %v2071_v8 }
0x1348   :  { %v2079_v10 = vmul.f32 1.442695, %v2076_v44 }
0x1349   :  { %v2077_v12 = vmul.f32 1.442695, %v2075_v9  ;;  %v3741_v13 = vpop.permute.xlu1 %3740 }
0x134a   :  { %3810 = vpow2.f32 %v2079_v10  ;;  %v3743_v15 = vunpack.i.h.bf16 %v3741_v13  ;;  %v3742_v19 = vunpack.i.l.bf16 %v3741_v13  ;;  %v2980_v13 = vld [vmem:[%s4601_s4 + $0x30] sm:$0xff] }
0x134b   :  { %3812 = vpow2.f32 %v2077_v12  ;;  %v2978_v12 = vld [vmem:[%s4601_s4 + $0x20] sm:$0xff] }
0x134c   :  { %v3572_v45 = vpack.c.bf16 %v3743_v15, %v3742_v19  ;;  %v2981_v19 = vld [vmem:[%s4601_s4 + $0x38] sm:$0xff] }
0x134d   :  { %v2179_v40 = vpop.permute.xlu1 %2178 }
0x134e   :  { %3573 = vmatprep.subr.bf16.mxu1 %v3572_v45 }
0x134f   :  { %3575 = vmatpush3.bf16.msra.mxu1 %v3572_v45  ;;  %v3590_v45 = vpack.c.bf16 %v2981_v19, %v2980_v13 }
0x1354   :  { %v3811_v58 = vpop.eup %3810 }
0x1355   :  { %v2084_v24 = vsel %vm365_vm5, %v3811_v58, 0.0  ;;  %v3813_v22 = vpop.eup %3812 }
0x1356   :  { %2085 = vadd.xlane.f32.xlu0 %v2084_v24  ;;  %v2081_v46 = vsel %vm365_vm5, %v3813_v22, 0.0 }
0x135a   :  { %2082 = vadd.xlane.f32.xlu0 %v2081_v46 }
0x1370   :  { %3745 = vrot.lane.b32.xlu0 %v4331_v29, %s3868_s16  ;;  %v2181_v29 = vpop.permute.xlu1 %2180 }
0x13e3   :  { %v2086_v25 = vpop.xlane.xlu0 %2085 }
0x13e4   :  { %3814 = vrcp.f32 %v2086_v25 }
0x13e7   :  { %v2083_v27 = vpop.xlane.xlu0 %2082 }
0x13e8   :  { %3816 = vrcp.f32 %v2083_v27 }
0x13eb   :  { %v3746_v28 = vpop.permute.xlu0 %3745 }
0x13ec   :  { %v3748_v31 = vunpack.i.h.bf16 %v3746_v28  ;;  %v3747_v32 = vunpack.i.l.bf16 %v3746_v28 }
0x13ee   :  { %v3576_v33 = vpack.c.bf16 %v3748_v31, %v3747_v32  ;;  %v3815_v34 = vpop.eup %3814 }
0x13ef   :  { %v2090_v39 = vmul.f32 %v3815_v34, %v3811_v58 }
0x13f0   :  { %3578 = vmatprep.subr.msk.bf16.mxu1 %vm4103_vm4, %v3576_v33 }
0x13f2   :  { %v3817_v35 = vpop.eup %3816 }
0x13f3   :  { %v2089_v38 = vmul.f32 %v3817_v35, %v3813_v22 }
0x13f5   :  { %3333 = vmatprep.mubr.msk.f32.mxu1 %vm365_vm5, %v2089_v38 }
0x13f6   :  { %3334 = vmatmul.mubr.msk.f32.vlgmr.msra.gmra.mrb[18].mxu1 %vm365_vm5, %v2090_v39 }
0x13f7   :  { %3581 = vmatpush3.bf16.xpose.msk.msra.mxu1 %vm4103_vm4, %v3576_v33  ;;  %3340 = vmatprep.mubr.msk.f32.mxu1 %vm279_vm3, %v2179_v40 }
0x13fe   :  { %3341 = vmatmul.mubr.msk.f32.vlgmr.msra.gmra.mrb[20].mxu1 %vm279_vm3, %v2181_v29 }
0x14c9   :  { %v3335_v41 = vpop.f32.mrb[18].mxu1 }
0x14ca   :  { %v2169_v63 = vpop.f32.mrb[19].mxu1 }
0x14d1   :  { %v3342_v42 = vpop.f32.mrb[20].mxu1 }
0x14d2   :  { %v2266_v43 = vadd.f32 %v3342_v42, %v4066_v61  ;;  %v2260_v50 = vpop.f32.mrb[21].mxu1 }
0x14d3   :  { %v2261_v52 = vadd.f32 %v2260_v50, %v4060_v54 }
0x14d4   :  { %v2272_v37 = vsel %vm365_vm5, %v2266_v43, -inf }
0x14d5   :  { %2273 = vmax.xlane.f32.xlu1 %v2272_v37  ;;  %v2269_v53 = vsel %vm365_vm5, %v2261_v52, -inf  ;;  %v4465_v37 = vld [vmem:[%s4598_s1 + $0x10] sm:$0xff] }
0x14d6   :  { %2270 = vmax.xlane.f32.xlu0 %v2269_v53 }
0x14e6   :  { %3750 = vrot.lane.b32.xlu1 %v4322_v51, %s3869_s2 }
0x14ea   :  { %2382 = vrot.lane.b32.xlu1 %v4389_v62, %s3870_s17 }
0x14ee   :  { %2388 = vrot.lane.b32.xlu1 %v2169_v63, %s3871_s0 }
0x1562   :  { %v2274_v30 = vpop.xlane.xlu1 %2273 }
0x1563   :  { %v2276_v55 = vsub.f32 %v2266_v43, %v2274_v30  ;;  %v2271_v61 = vpop.xlane.xlu0 %2270 }
0x1564   :  { %v2275_v56 = vsub.f32 %v2261_v52, %v2271_v61  ;;  %v2528_v52 = vsub.s32 7, %v4050_v49 }
0x1565   :  { %v2279_v36 = vmul.f32 1.442695, %v2276_v55 }
0x1566   :  { %v2277_v54 = vmul.f32 1.442695, %v2275_v56  ;;  %v3751_v57 = vpop.permute.xlu1 %3750  ;;  %v4468_v53 = vrot.slane %v4465_v37, %v2528_v52 }
0x1567   :  { %v3753_v47 = vunpack.i.h.bf16 %v3751_v57  ;;  %v3752_v1 = vunpack.i.l.bf16 %v3751_v57 }
0x1568   :  { %3818 = vpow2.f32 %v2277_v54 }
0x1569   :  { %v3582_v48 = vpack.c.bf16 %v3753_v47, %v3752_v1  ;;  %3820 = vpow2.f32 %v2279_v36  ;;  %v2984_v1 = vld [vmem:[%s4602_s5 + $0x20] sm:$0xff] }
0x156a   :  { %v2383_v46 = vpop.permute.xlu1 %2382 }
0x156b   :  { %3583 = vmatprep.subr.bf16.mxu0 %v3582_v48  ;;  %v2403_v32 = vsel %vm279_vm3, %v4385_v59, %v2383_v46 }
0x156c   :  { %3585 = vmatpush3.bf16.msra.mxu0 %v3582_v48  ;;  %v2985_v48 = vld [vmem:[%s4602_s5 + $0x28] sm:$0xff] }
0x156e   :  { %v2389_v27 = vpop.permute.xlu1 %2388 }
0x1572   :  { %v3819_v51 = vpop.eup %3818 }
0x1573   :  { %v2281_v5 = vsel %vm365_vm5, %v3819_v51, 0.0  ;;  %v3821_v62 = vpop.eup %3820 }
0x1574   :  { %2282 = vadd.xlane.f32.xlu0 %v2281_v5  ;;  %v2284_v16 = vsel %vm365_vm5, %v3821_v62, 0.0  ;;  %v2986_v5 = vld [vmem:[%s4602_s5 + $0x30] sm:$0xff] }
0x1578   :  { %2285 = vadd.xlane.f32.xlu0 %v2284_v16 }
0x158e   :  { %2380 = vrot.lane.b32.xlu0 %v4391_v18, %s3870_s17  ;;  %v2979_v18 = vld [vmem:[%s4601_s4 + $0x28] sm:$0xff] }
0x158f   :  { %v3586_v15 = vpack.c.bf16 %v2979_v18, %v2978_v12  ;;  %v2995_v12 = vld [vmem:[%s4603_s6 + $0x68] sm:$0xff] }
0x1591   :  { %3587 = vmatprep.subr.bf16.mxu0 %v3586_v15 }
0x1592   :  { %2390 = vrot.lane.b32.xlu0 %v3335_v41, %s3871_s0 }
0x1601   :  { %v2283_v2 = vpop.xlane.xlu0 %2282 }
0x1602   :  { %3822 = vrcp.f32 %v2283_v2  ;;  %v2990_v2 = vld [vmem:[%s4603_s6 + $0x40] sm:$0xff] }
0x1605   :  { %v2286_v4 = vpop.xlane.xlu0 %2285 }
0x1606   :  { %3824 = vrcp.f32 %v2286_v4  ;;  %v2991_v4 = vld [vmem:[%s4603_s6 + $0x48] sm:$0xff] }
0x1609   :  { %v2381_v22 = vpop.permute.xlu0 %2380 }
0x160a   :  { %v2402_v28 = vsel %vm279_vm3, %v4387_v60, %v2381_v22 }
0x160b   :  { %v2404_v34 = vsel %vm365_vm5, %v2402_v28, %v2389_v27 }
0x160c   :  { %v3823_v44 = vpop.eup %3822 }
0x160d   :  { %v2289_v8 = vmul.f32 %v3823_v44, %v3819_v51  ;;  %v2391_v25 = vpop.permute.xlu0 %2390  ;;  %v3594_v51 = vpack.c.bf16 %v2985_v48, %v2984_v1  ;;  %v3602_v44 = vpack.c.bf16 %v2991_v4, %v2990_v2 }
0x160e   :  { %v2405_v35 = vsel %vm365_vm5, %v2403_v32, %v2391_v25 }
0x160f   :  { %3347 = vmatprep.mubr.msk.f32.mxu0 %vm365_vm5, %v2289_v8  ;;  %3595 = vmatprep.subr.bf16.mxu1 %v3594_v51  ;;  %v2993_v8 = vld [vmem:[%s4603_s6 + $0x58] sm:$0xff] }
0x1610   :  { %v3825_v9 = vpop.eup %3824  ;;  %3597 = vmatpush3.bf16.msra.mxu1 %v3594_v51 }
0x1611   :  { %v2290_v10 = vmul.f32 %v3825_v9, %v3821_v62  ;;  %v2987_v62 = vld [vmem:[%s4602_s5 + $0x38] sm:$0xff] }
0x1612   :  { %v3598_v16 = vpack.c.bf16 %v2987_v62, %v2986_v5 }
0x1613   :  { %3348 = vmatmul.mubr.msk.f32.vlgmr.msra.gmra.mrb[24].mxu0 %vm365_vm5, %v2290_v10  ;;  %v2994_v10 = vld [vmem:[%s4603_s6 + $0x60] sm:$0xff] }
0x1614   :  { %3589 = vmatpush3.bf16.msra.mxu0 %v3586_v15  ;;  %3599 = vmatprep.subr.bf16.mxu1 %v3598_v16  ;;  %v3610_v18 = vpack.c.bf16 %v2995_v12, %v2994_v10 }
0x1615   :  { %3591 = vmatprep.subr.bf16.mxu0 %v3590_v45  ;;  %3601 = vmatpush3.bf16.msra.mxu1 %v3598_v16 }
0x1616   :  { %3620 = vmatprep.subr.msk.bf16.mxu1 %vm4524_vm8, %v3931_v6 }
0x1618   :  { %3593 = vmatpush3.bf16.msra.mxu0 %v3590_v45 }
0x1619   :  { %3603 = vmatprep.subr.bf16.mxu0 %v3602_v44 }
0x16e6   :  { %v3349_v58 = vpop.f32.mrb[24].mxu0 }
0x16e7   :  { %2398 = vrot.lane.b32.xlu0 %v3349_v58, %s3872_s26  ;;  %v2369_v24 = vpop.f32.mrb[25].mxu0 }
0x16e8   :  { %2396 = vrot.lane.b32.xlu1 %v2369_v24, %s3872_s26 }
0x16ec   :  { %2414 = vrot.lane.b32.xlu1 %v4313_v3, %s3863_s11 }
0x1759   :  { %v2399_v31 = vpop.permute.xlu0 %2398 }
0x175a   :  { %v2397_v33 = vpop.permute.xlu1 %2396  ;;  %v2407_v39 = vsel %vm1099_vm6, %v2405_v35, %v2399_v31  ;;  %v2996_v35 = vld [vmem:[%s4603_s6 + $0x70] sm:$0xff] }
0x175b   :  { %v2406_v38 = vsel %vm1099_vm6, %v2404_v34, %v2397_v33 }
0x175c   :  { %3358 = vmatprep.mubr.msk.f32.mxu0 %vm145_vm2, %v2406_v38  ;;  %v2997_v38 = vld [vmem:[%s4603_s6 + $0x78] sm:$0xff] }
0x175d   :  { %3359 = vmatmul.mubr.msk.f32.vlgmr.msra.gmra.mrb[26].mxu0 %vm145_vm2, %v2407_v39  ;;  %v3614_v39 = vpack.c.bf16 %v2997_v38, %v2996_v35 }
0x175e   :  { %v2415_v40 = vpop.permute.xlu1 %2414  ;;  %3605 = vmatpush3.bf16.msra.mxu0 %v3602_v44 }
0x1830   :  { %v3360_v29 = vpop.f32.mrb[26].mxu0 }
0x1831   :  { %v2495_v60 = vadd.f32 %v3360_v29, %v2415_v40  ;;  %v2489_v41 = vpop.f32.mrb[27].mxu0 }
0x1832   :  { %v2490_v63 = vadd.f32 %v2489_v41, %v2415_v40  ;;  %v2545_v40 = vsub.s32 6, %v4050_v49 }
0x1833   :  { %v2499_v59 = vadd.f32 %v2495_v60, %v4305_v21 }
0x1834   :  { %v2498_v42 = vadd.f32 %v2490_v63, %v4300_v0  ;;  %v2546_v29 = vrot.slane %v4465_v37, %v2545_v40 }
0x1835   :  { %v2503_v43 = vsel %vm145_vm2, %v2499_v59, 0.0 }
0x1836   :  { %2504 = vadd.xlane.f32.xlu1 %v2503_v43  ;;  %v2500_v50 = vsel %vm145_vm2, %v2498_v42, 0.0 }
0x1837   :  { %2501 = vadd.xlane.f32.xlu0 %v2500_v50 }
0x1847   :  { %2533 = vrot.lane.b32.xlu1 %v4468_v53, %s3863_s11 }
0x18c3   :  { %v2505_v0 = vpop.xlane.xlu1 %2504 }
0x18c4   :  { %v2507_v21 = vmul.f32 0.03125, %v2505_v0  ;;  %v2502_v30 = vpop.xlane.xlu0 %2501 }
0x18c5   :  { %v2506_v55 = vmul.f32 0.03125, %v2502_v30 }
0x18c6   :  { %v2509_v61 = vsub.f32 %v2499_v59, %v2507_v21 }
0x18c7   :  { %v2508_v56 = vsub.f32 %v2498_v42, %v2506_v55  ;;  %v2534_v25 = vpop.permute.xlu1 %2533 }
0x18c8   :  { %v2511_v57 = vmul.f32 %v2509_v61, %v2509_v61 }
0x18c9   :  { %v2510_v36 = vmul.f32 %v2508_v56, %v2508_v56 }
0x18ca   :  { %v2515_v47 = vsel %vm145_vm2, %v2511_v57, 0.0 }
0x18cb   :  { %v2512_v54 = vsel %vm145_vm2, %v2510_v36, 0.0 }
0x18cc   :  { %2513 = vadd.xlane.f32.xlu0 %v2512_v54 }
0x18d0   :  { %2516 = vadd.xlane.f32.xlu0 %v2515_v47 }
0x18e6   :  { %2639 = vrot.lane.b32.xlu0 %v4313_v3, %s3862_s29  ;;  %v2992_v3 = vld [vmem:[%s4603_s6 + $0x50] sm:$0xff]  ;;  %s3874_s6 = smov [#allocation2]  }
0x18e7   :  { %v3606_v9 = vpack.c.bf16 %v2993_v8, %v2992_v3 }
0x18e9   :  { %3607 = vmatprep.subr.bf16.mxu0 %v3606_v9 }
0x18ea   :  { %3609 = vmatpush3.bf16.msra.mxu0 %v3606_v9 }
0x18eb   :  { %3611 = vmatprep.subr.bf16.mxu0 %v3610_v18 }
0x18ee   :  { %3613 = vmatpush3.bf16.msra.mxu0 %v3610_v18 }
0x18ef   :  { %3615 = vmatprep.subr.bf16.mxu0 %v3614_v39 }
0x18f2   :  { %3617 = vmatpush3.bf16.msra.mxu0 %v3614_v39 }
0x1959   :  { %v2514_v13 = vpop.xlane.xlu0 %2513 }
0x195a   :  { %v2518_v15 = vmul.f32 0.03125, %v2514_v13 }
0x195c   :  { %v2520_v19 = vadd.f32 1e-05, %v2518_v15 }
0x195d   :  { %v2517_v45 = vpop.xlane.xlu0 %2516 }
0x195e   :  { %3826 = vrsqrt.f32 %v2520_v19  ;;  %v2519_v58 = vmul.f32 0.03125, %v2517_v45 }
0x1960   :  { %v2521_v24 = vadd.f32 1e-05, %v2519_v58 }
0x1961   :  { %v2640_v50 = vpop.permute.xlu0 %2639 }
0x1962   :  { %3828 = vrsqrt.f32 %v2521_v24 }
0x1968   :  { %v3827_v22 = vpop.eup %3826 }
0x1969   :  { %v2524_v46 = vmul.f32 %v3827_v22, %v2508_v56 }
0x196b   :  { %v2530_v27 = vmul.f32 %v4468_v53, %v2524_v46 }
0x196c   :  { %v3829_v28 = vpop.eup %3828 }
0x196d   :  { %v2525_v31 = vmul.f32 %v3829_v28, %v2509_v61  ;;  %v2536_v32 = vadd.f32 %v2534_v25, %v2530_v27 }
0x196f   :  { %v2531_v33 = vmul.f32 %v4468_v53, %v2525_v31  ;;  %3369 = vmatprep.mubr.msk.f32.mxu1 %vm145_vm2, %v2536_v32 }
0x1971   :  { %v2537_v34 = vadd.f32 %v2534_v25, %v2531_v33 }
0x1973   :  { %3370 = vmatmul.mubr.msk.f32.vlgmr.msra.gmra.mrb[22].mxu1 %vm145_vm2, %v2537_v34 }
0x1974   :  { %3623 = vmatpush3.bf16.xpose.msk.msra.mxu1 %vm4524_vm8, %v3931_v6 }
0x1975   :  { %3626 = vmatprep.subr.msk.bf16.mxu1 %vm4524_vm8, %v3933_v7 }
0x197c   :  { %3629 = vmatpush3.bf16.xpose.msk.msra.mxu1 %vm4524_vm8, %v3933_v7 }
0x197d   :  { %3632 = vmatprep.subr.msk.bf16.mxu1 %vm4524_vm8, %v3947_v11 }
0x1984   :  { %3635 = vmatpush3.bf16.xpose.msk.msra.mxu1 %vm4524_vm8, %v3947_v11 }
0x1985   :  { %3638 = vmatprep.subr.msk.bf16.mxu1 %vm4524_vm8, %v3957_v14 }
0x198c   :  { %3641 = vmatpush3.bf16.xpose.msk.msra.mxu1 %vm4524_vm8, %v3957_v14 }
0x198d   :  { %3644 = vmatprep.subr.msk.bf16.mxu1 %vm4524_vm8, %v3967_v17 }
0x1994   :  { %3647 = vmatpush3.bf16.xpose.msk.msra.mxu1 %vm4524_vm8, %v3967_v17 }
0x1995   :  { %3650 = vmatprep.subr.msk.bf16.mxu1 %vm4524_vm8, %v3977_v20 }
0x199c   :  { %3653 = vmatpush3.bf16.xpose.msk.msra.mxu1 %vm4524_vm8, %v3977_v20 }
0x199d   :  { %3656 = vmatprep.subr.msk.bf16.mxu1 %vm4524_vm8, %v3987_v23 }
0x19a4   :  { %3659 = vmatpush3.bf16.xpose.msk.msra.mxu1 %vm4524_vm8, %v3987_v23 }
0x19a5   :  { %3662 = vmatprep.subr.msk.bf16.mxu1 %vm4524_vm8, %v3997_v26 }
0x19ac   :  { %3665 = vmatpush3.bf16.xpose.msk.msra.mxu1 %vm4524_vm8, %v3997_v26 }
0x1a46   :  { %v3371_v60 = vpop.f32.mrb[22].mxu1 }
0x1a47   :  { %v2625_v41 = vadd.f32 %v3371_v60, %v2546_v29  ;;  %v2619_v63 = vpop.f32.mrb[23].mxu1 }
0x1a48   :  { %v2620_v59 = vadd.f32 %v2619_v63, %v2546_v29 }
0x1a49   :  { %v2629_v43 = vmax.f32 %v2625_v41, 0.0 }
0x1a4a   :  { %v2628_v42 = vmax.f32 %v2620_v59, 0.0 }
0x1a4c   :  { %3388 = vmatprep.mubr.msk.f32.mxu0 %vm1334_vm7, %v2628_v42 }
0x1a4d   :  { %3389 = vmatmul.mubr.msk.f32.vlgmr.msra.gmra.mrb[28].mxu0 %vm1334_vm7, %v2629_v43 }
0x1b20   :  { %v3390_v52 = vpop.f32.mrb[28].mxu0 }
0x1b21   :  { %v2720_v0 = vadd.f32 %v3390_v52, %v2640_v50  ;;  %v2714_v21 = vpop.f32.mrb[29].mxu0 }
0x1b22   :  { %v2715_v30 = vadd.f32 %v2714_v21, %v2640_v50 }
0x1b23   :  { %v2724_v55 = vadd.f32 %v2720_v0, %v2537_v34 }
0x1b24   :  { %v2723_v61 = vadd.f32 %v2715_v30, %v2536_v32 }
0x1b25   :  { %v2728_v49 = vsel %vm145_vm2, %v2724_v55, 0.0 }
0x1b26   :  { %2729 = vadd.xlane.f32.xlu0 %v2728_v49  ;;  %v2725_v37 = vsel %vm145_vm2, %v2723_v61, 0.0 }
0x1b27   :  { %2726 = vadd.xlane.f32.xlu1 %v2725_v37 }
0x1bb3   :  { %v2730_v6 = vpop.xlane.xlu0 %2729 }
0x1bb4   :  { %v2732_v7 = vmul.f32 0.03125, %v2730_v6  ;;  %v2727_v11 = vpop.xlane.xlu1 %2726 }
0x1bb5   :  { %v2731_v14 = vmul.f32 0.03125, %v2727_v11 }
0x1bb6   :  { %v2734_v17 = vsub.f32 %v2724_v55, %v2732_v7 }
0x1bb7   :  { %v2733_v20 = vsub.f32 %v2723_v61, %v2731_v14 }
0x1bb8   :  { %v2736_v36 = vmul.f32 %v2734_v17, %v2734_v17 }
0x1bb9   :  { %v2735_v54 = vmul.f32 %v2733_v20, %v2733_v20 }
0x1bba   :  { %v2740_v57 = vsel %vm145_vm2, %v2736_v36, 0.0 }
0x1bbb   :  { %2741 = vadd.xlane.f32.xlu0 %v2740_v57  ;;  %v2737_v23 = vsel %vm145_vm2, %v2735_v54, 0.0 }
0x1bbc   :  { %2738 = vadd.xlane.f32.xlu1 %v2737_v23 }
0x1bcd   :  { %2751 = vrot.lane.b32.xlu1 %v4468_v53, %s3862_s29  ;;  %s2897_s29 = sshll.u32 %s3874_s6, 4  ;;  %s2898_s29 = int_to_ptr.vmem [resolvable:$true] %s2897_s29 }
0x1bce   :  { %p3840_p1 = scmp.lt.s32.totalorder %s2898_s29, %s2898_s29 }
0x1bd1   :  { %2756 = vrot.lane.b32.xlu0 %v4468_v53, %s3873_s9  ;;  %s3835_s9 = scalar_lea.vmem %s2898_s29, 256 }
0x1bd2   :  { %p3836_p0 = scmp.ne.s32.totalorder %s2898_s29, %s3835_s9  ;;  %p3841_p2 = scmp.lt.s32.totalorder %s3835_s9, %s3835_s9 }
0x1bd4   :  { %p3842_p3 = por %p3841_p2, %p3840_p1 }
0x1bd6   :  { %p3843_p4 = pnand %p3842_p3, %p3836_p0 }
0x1c48   :  { %v2742_v26 = vpop.xlane.xlu0 %2741 }
0x1c49   :  { %v2744_v47 = vmul.f32 0.03125, %v2742_v26  ;;  %v2739_v1 = vpop.xlane.xlu1 %2738 }
0x1c4a   :  { %v2743_v48 = vmul.f32 0.03125, %v2739_v1 }
0x1c4b   :  { %v2746_v51 = vadd.f32 1e-05, %v2744_v47 }
0x1c4c   :  { %v2745_v5 = vadd.f32 1e-05, %v2743_v48  ;;  %v2757_v8 = vpop.permute.xlu0 %2756 }
0x1c4d   :  { %3830 = vrsqrt.f32 %v2746_v51  ;;  %v2752_v16 = vpop.permute.xlu1 %2751 }
0x1c4e   :  { %3832 = vrsqrt.f32 %v2745_v5 }
0x1c57   :  { %v3831_v62 = vpop.eup %3830 }
0x1c58   :  { %v3833_v2 = vpop.eup %3832  ;;  %v2750_v4 = vmul.f32 %v3831_v62, %v2734_v17 }
0x1c59   :  { %v2749_v3 = vmul.f32 %v3833_v2, %v2733_v20 }
0x1c5a   :  { %v2755_v44 = vmul.f32 %v2752_v16, %v2750_v4 }
0x1c5b   :  { %v2754_v9 = vmul.f32 %v2752_v16, %v2749_v3 }
0x1c5c   :  { %v2760_v12 = vadd.f32 %v2757_v8, %v2755_v44 }
0x1c5d   :  { %v2759_v10 = vadd.f32 %v2757_v8, %v2754_v9 }
0x1c5f   :  { %3423 = vmatprep.mubr.msk.f32.mxu1 %vm145_vm2, %v2759_v10 }
0x1c60   :  { %3424 = vmatmul.mubr.msk.f32.vlgmr.msra.gmra.mrb[24].mxu1 %vm145_vm2, %v2760_v12 }
0x1d33   :  { %v3425_v53 = vpop.f32.mrb[24].mxu1 }
0x1d34   :  { %2891 = vst [vmem:[#allocation2 + $0x8] sm:$0xff] %v3425_v53  ;;  %v2881_v18 = vpop.f32.mrb[25].mxu1 }
0x1d35   :  { %2890 = vst [vmem:[#allocation2] sm:$0xff] %v2881_v18 }
0x1d36   :  { %3846 = shalt.err (!%p3843_p4)
}
0x1d37   :  { %s3847_s1 = scalar_lea.hbm %s4604_s7, 256 }
0x1d38   :  { %p3848_p5 = scmp.ne.s32.totalorder %s4604_s7, %s3847_s1  ;;  %p3851_p6 = scmp.lt.u32.totalorder %s3847_s1, %s4604_s7 }
0x1d3a   :  { %p3853_p7 = pnand %p3851_p6, %p3848_p5 }
0x1d3c   :  { %3856 = shalt.err (!%p3853_p7)
}
0x1d3d   :  { %s3875_s30 = smov 128  }
0x1d3e   :  { %2903 = dma.vmem_to_hbm [thread:$0]  %s2898_s29, 256, %s4604_s7, [#allocation3], %s3875_s30, %s3875_s30, %s3870_s17  }
0x1d3f   :  { %3857 = dma.done.wait [#allocation3], 256  }
0x1d40   :  { %3858 = vsyncadd [#allocation3], 4294967040 }
0x1d41   :  { %2907 = vsyncpa [#allocation3], 1 }

</bundles_post_ra>
